<compile_context>
chip_gen: v6e
topology: v6e:2x2x1
jax: 0.10.0
libtpu: 0.0.40
codegen_flags: <defaults>
</compile_context>

<pallas_src>
import functools

import jax
import jax.numpy as jnp
from jax.experimental import pallas as pl
from jax.experimental.pallas import tpu as pltpu


def _round_up(x, m):
    return ((x + m - 1) // m) * m


# ----------------------------- Pallas kernel ------------------------------

def commnet_kernel(obs_ref, h0_ref,
                   w_enc_ref, b_enc_ref,
                   w_gru_ref, b_gru_ref,
                   comm_ref,
                   w_dec_ref, b_dec_ref,
                   q_ref, h_ref,
                   *, fold_dim, comm_rounds, inv_agents):
    """Agent-folded CommNet forward for one tile of (groups, n_agents*H) rows."""
    F = fold_dim
    mm = w_gru_ref.dtype                     # matmul-operand dtype (bf16 or f32)

    # Resident weights: read once per tile.  Biases stay (1, X); the adds below use a
    # cheap sublane broadcast instead of a full (rows, X) materialization.
    w_enc = w_enc_ref[...]
    w_gru = w_gru_ref[...]
    comm = comm_ref[...]
    w_dec = w_dec_ref[...]
    b_enc = b_enc_ref[...]
    b_gru = b_gru_ref[...]
    b_dec = b_dec_ref[...]

    def gru_cell(x_mm, h_prev, h_prev_mm):
        # Folded PyTorch GRUCell.  Column groups of the fused weight are
        # [r | z | n_i | n_h], each F = n_agents*H lanes wide, so the single dot
        # directly yields the (i_r + h_r) and (i_z + h_z) pre-activations.
        xh = jnp.concatenate([x_mm, h_prev_mm], axis=-1)           # (rows, 2F)
        g = jnp.dot(xh, w_gru, preferred_element_type=jnp.float32) + b_gru
        r = jax.nn.sigmoid(g[:, 0:F])
        z = jax.nn.sigmoid(g[:, F:2 * F])
        n = jnp.tanh(g[:, 2 * F:3 * F] + r * g[:, 3 * F:4 * F])
        return (1.0 - z) * n + z * h_prev

    # obs encoding + sigmoid (obs already supplied in the matmul dtype)
    x = jax.nn.sigmoid(
        jnp.dot(obs_ref[...], w_enc, preferred_element_type=jnp.float32) + b_enc)

    h = h0_ref[...]                          # f32 hidden state
    h_mm = h.astype(mm)
    h = gru_cell(x.astype(mm), h, h_mm)

    # k communication rounds.  `comm` is an exact 0/1 kron(1-I_nA, I_H) mask; the
    # 1/n_agents scale is applied on the f32 accumulator, so the masked mean is exact
    # for any n_agents even with bf16 operands.
    for _ in range(comm_rounds):
        h_mm = h.astype(mm)                  # cast once per round, reused by both dots
        c = jnp.dot(h_mm, comm, preferred_element_type=jnp.float32) * inv_agents
        h = gru_cell(c.astype(mm), h, h_mm)

    # decode; q and h are emitted as two exact-width outputs (no lane zero-padding)
    q_ref[...] = (jnp.dot(h.astype(mm), w_dec,
                          preferred_element_type=jnp.float32) + b_dec).astype(q_ref.dtype)
    h_ref[...] = h.astype(h_ref.dtype)


# ------------------------------ JAX wrapper -------------------------------

def commnet_forward(obs, hidden_state, params, *, n_agents, hidden_dim, comm_rounds,
                    tile_groups=None, matmul_dtype=jnp.bfloat16):
    """obs: (N, input_shape); hidden_state: reshapable to (N, hidden_dim); N = batch*n_agents."""
    N, input_dim = obs.shape
    H = hidden_dim
    nA = n_agents
    A = params["w_dec"].shape[1]
    assert N % nA == 0, "rows must be a multiple of n_agents"
    n_groups = N // nA
    F = nA * H                                       # folded lane width (128 for nA=4, H=32)

    # --- row tile in *group* units (multiple of 8 sublanes) ---
    if tile_groups is None:
        tile_g = min(_round_up(n_groups, 8), 512)    # 512 groups = 2048 agent rows
        # prefer >= 2 grid steps so the "parallel" axis can use both v7x TensorCores
        if _round_up(n_groups, tile_g) == tile_g and tile_g > 8:
            tile_g = _round_up((tile_g + 1) // 2, 8)
    else:
        tile_g = _round_up(tile_groups, 8)
    num_tiles = pl.cdiv(n_groups, tile_g)
    n_groups_pad = num_tiles * tile_g

    # --- agent-folded inputs: one row per group, agent a in lanes [a*W:(a+1)*W] ---
    obs_f = obs.reshape(n_groups, nA * input_dim)
    h0_f = hidden_state.reshape(-1, H).reshape(n_groups, F).astype(jnp.float32)
    if n_groups_pad != n_groups:
        pad = n_groups_pad - n_groups
        obs_f = jnp.pad(obs_f, ((0, pad), (0, 0)))   # padded groups are isolated -> safe
        h0_f = jnp.pad(h0_f, ((0, pad), (0, 0)))
    obs_f = obs_f.astype(matmul_dtype)

    # --- agent-folded weights (kron with I_nA keeps agents independent) ---
    eye_nA = jnp.eye(nA, dtype=jnp.float32)
    kron = jnp.kron

    w_enc_f = kron(eye_nA, params["w_enc"].astype(jnp.float32)).astype(matmul_dtype)  # (nA*In, F)
    b_enc_f = jnp.tile(params["b_enc"].astype(jnp.float32), (1, nA))                  # (1, F)

    # GRU: rows = [x_fold | h_fold] (2F), cols = [r | z | n_i | n_h] (each F lanes).
    w_ih = params["w_ih"].astype(jnp.float32)        # (H, 3H), gate order r, z, n
    w_hh = params["w_hh"].astype(jnp.float32)
    zH = jnp.zeros((H, H), jnp.float32)
    top = [w_ih[:, :H], w_ih[:, H:2 * H], w_ih[:, 2 * H:], zH]      # from x
    bot = [w_hh[:, :H], w_hh[:, H:2 * H], zH, w_hh[:, 2 * H:]]      # from h
    w_gru_f = jnp.concatenate(
        [jnp.concatenate([kron(eye_nA, blk) for blk in row], axis=1)
         for row in (top, bot)], axis=0).astype(matmul_dtype)       # (2F, 4F)

    b_ih = params["b_ih"].astype(jnp.float32)
    b_hh = params["b_hh"].astype(jnp.float32)
    b_gru_f = jnp.concatenate(
        [jnp.tile(b, (1, nA)) for b in
         (b_ih[:, :H] + b_hh[:, :H],                 # r bias already summed
          b_ih[:, H:2 * H] + b_hh[:, H:2 * H],       # z bias already summed
          b_ih[:, 2 * H:],                           # n_i bias
          b_hh[:, 2 * H:])], axis=1)                 # n_h bias
    # (1, 4F)

    # Exact 0/1 communication mask; scaled by 1/nA inside the kernel in f32.
    comm = kron(1.0 - eye_nA, jnp.eye(H, dtype=jnp.float32)).astype(matmul_dtype)     # (F, F)

    w_dec_f = kron(eye_nA, params["w_dec"].astype(jnp.float32)).astype(matmul_dtype)  # (F, nA*A)
    b_dec_f = jnp.tile(params["b_dec"].astype(jnp.float32), (1, nA))                  # (1, nA*A)

    kernel = functools.partial(commnet_kernel, fold_dim=F,
                               comm_rounds=comm_rounds, inv_agents=1.0 / nA)

    def rows_spec(width):
        return pl.BlockSpec((tile_g, width), lambda i: (i, 0))

    def resident(arr):
        return pl.BlockSpec(arr.shape, lambda i: (0, 0))

    q_f, h_f = pl.pallas_call(
        kernel,
        grid=(num_tiles,),
        in_specs=[rows_spec(nA * input_dim),         # obs   (row-tiled)
                  rows_spec(F),                      # h0    (row-tiled)
                  resident(w_enc_f), resident(b_enc_f),
                  resident(w_gru_f), resident(b_gru_f),
                  resident(comm),
                  resident(w_dec_f), resident(b_dec_f)],
        out_specs=[rows_spec(nA * A), rows_spec(F)],
        out_shape=(jax.ShapeDtypeStruct((n_groups_pad, nA * A), jnp.float32),
                   jax.ShapeDtypeStruct((n_groups_pad, F), jnp.float32)),
        compiler_params=pltpu.CompilerParams(
            dimension_semantics=("parallel",),       # shards tiles across v7x's 2 TCs
            vmem_limit_bytes=32 * 1024 * 1024),      # small footprint; safe on v5e/v6e/v7x
    )(obs_f, h0_f, w_enc_f, b_enc_f, w_gru_f, b_gru_f, comm, w_dec_f, b_dec_f)

    # un-fold: (groups, nA*X) -> (N, X)
    q = q_f.reshape(n_groups_pad * nA, A)[:N]
    h = h_f.reshape(n_groups_pad * nA, H)[:N]
    return q, h


# -------------------------- pure-JAX reference ----------------------------

def commnet_reference(obs, hidden_state, params, *, n_agents, hidden_dim, comm_rounds):
    H = hidden_dim

    def gru(x, h):
        gi = x @ params["w_ih"] + params["b_ih"]
        gh = h @ params["w_hh"] + params["b_hh"]
        r = jax.nn.sigmoid(gi[:, :H] + gh[:, :H])
        z = jax.nn.sigmoid(gi[:, H:2 * H] + gh[:, H:2 * H])
        n = jnp.tanh(gi[:, 2 * H:] + r * gh[:, 2 * H:])
        return (1 - z) * n + z * h

    x = jax.nn.sigmoid(obs @ params["w_enc"] + params["b_enc"])
    h = gru(x, hidden_state.reshape(-1, H))
    mask = 1.0 - jnp.eye(n_agents, dtype=jnp.float32)
    for _ in range(comm_rounds):
        h3 = h.reshape(-1, n_agents, H)
        c = jnp.einsum("ij,bjh->bih", mask, h3) / n_agents
        h = gru(c.reshape(-1, H), h)
    q = h @ params["w_dec"] + params["b_dec"]
    return q, h


# --------------------------------- main -----------------------------------

if __name__ == "__main__":
    # module args: n_agents=4, rnn_hidden_dim=32, n_actions=8, k=2; input_shape=32; batch=5
    batch, n_agents = 5, 4
    input_shape, hidden_dim, n_actions, k = 32, 32, 8, 2
    N = batch * n_agents

    key = jax.random.PRNGKey(0)
    keys = jax.random.split(key, 10)
    scale = 0.1
    params = {
        # nn.Linear(input_shape, H): stored transposed (input, H)
        "w_enc": scale * jax.random.normal(keys[0], (input_shape, hidden_dim), jnp.float32),
        "b_enc": scale * jax.random.normal(keys[1], (1, hidden_dim), jnp.float32),
        # nn.GRUCell(H, H): weight_ih/hh stored transposed (H, 3H); gate order r, z, n
        "w_ih": scale * jax.random.normal(keys[2], (hidden_dim, 3 * hidden_dim), jnp.float32),
        "b_ih": scale * jax.random.normal(keys[3], (1, 3 * hidden_dim), jnp.float32),
        "w_hh": scale * jax.random.normal(keys[4], (hidden_dim, 3 * hidden_dim), jnp.float32),
        "b_hh": scale * jax.random.normal(keys[5], (1, 3 * hidden_dim), jnp.float32),
        # nn.Linear(H, n_actions): stored transposed (H, n_actions)
        "w_dec": scale * jax.random.normal(keys[6], (hidden_dim, n_actions), jnp.float32),
        "b_dec": scale * jax.random.normal(keys[7], (1, n_actions), jnp.float32),
    }

    obs = jax.random.normal(keys[8], (N, input_shape), jnp.float32)
    hidden_state = jax.random.normal(keys[9], (N, hidden_dim), jnp.float32)

    q_ref, h_ref = commnet_reference(obs, hidden_state, params,
                                     n_agents=n_agents, hidden_dim=hidden_dim,
                                     comm_rounds=k)

    # 1) f32 matmul operands: exact path, default tiling (single tile + group padding).
    q32, h32 = commnet_forward(obs, hidden_state, params,
                               n_agents=n_agents, hidden_dim=hidden_dim,
                               comm_rounds=k, matmul_dtype=jnp.float32)
    jax.block_until_ready((q32, h32))
    assert q32.shape == (N, n_actions) and h32.shape == (N, hidden_dim)
    assert jnp.allclose(q32, q_ref, atol=1e-4, rtol=1e-4), \
        float(jnp.max(jnp.abs(q32 - q_ref)))
    assert jnp.allclose(h32, h_ref, atol=1e-4, rtol=1e-4), \
        float(jnp.max(jnp.abs(h32 - h_ref)))

    # 2) bf16 matmul operands + f32 accumulation (the performance configuration).
    qbf, hbf = commnet_forward(obs, hidden_state, params,
                               n_agents=n_agents, hidden_dim=hidden_dim,
                               comm_rounds=k, matmul_dtype=jnp.bfloat16)
    jax.block_until_ready((qbf, hbf))
    assert qbf.shape == (N, n_actions) and hbf.shape == (N, hidden_dim)
    assert jnp.allclose(qbf, q_ref, atol=5e-2, rtol=5e-2), \
        float(jnp.max(jnp.abs(qbf - q_ref)))
    assert jnp.allclose(hbf, h_ref, atol=5e-2, rtol=5e-2), \
        float(jnp.max(jnp.abs(hbf - h_ref)))

    # 3) Multi-tile grid + group padding path (batch=67 -> 67 groups, tile of 16 -> 5 tiles).
    batch2 = 67
    N2 = batch2 * n_agents
    obs2 = jax.random.normal(jax.random.PRNGKey(1), (N2, input_shape), jnp.float32)
    hs2 = jax.random.normal(jax.random.PRNGKey(2), (N2, hidden_dim), jnp.float32)
    q2_ref, h2_ref = commnet_reference(obs2, hs2, params,
                                       n_agents=n_agents, hidden_dim=hidden_dim,
                                       comm_rounds=k)
    q2, h2 = commnet_forward(obs2, hs2, params,
                             n_agents=n_agents, hidden_dim=hidden_dim,
                             comm_rounds=k, tile_groups=16, matmul_dtype=jnp.float32)
    jax.block_until_ready((q2, h2))
    assert q2.shape == (N2, n_actions) and h2.shape == (N2, hidden_dim)
    assert jnp.allclose(q2, q2_ref, atol=1e-4, rtol=1e-4), \
        float(jnp.max(jnp.abs(q2 - q2_ref)))
    assert jnp.allclose(h2, h2_ref, atol=1e-4, rtol=1e-4), \
        float(jnp.max(jnp.abs(h2 - h2_ref)))

    print("KERNEL_OK")
</pallas_src>

<mosaic_0001>
module attributes {stable_mosaic.version = 11 : i64} {
  func.func @commnet_kernel(%arg0: i32, %arg1: memref<8x128xf32, #tpu.memory_space<vmem>>, %arg2: memref<8x128xf32, #tpu.memory_space<vmem>>, %arg3: memref<128x128xf32, #tpu.memory_space<vmem>>, %arg4: memref<1x128xf32, #tpu.memory_space<vmem>>, %arg5: memref<256x512xf32, #tpu.memory_space<vmem>>, %arg6: memref<1x512xf32, #tpu.memory_space<vmem>>, %arg7: memref<128x128xf32, #tpu.memory_space<vmem>>, %arg8: memref<128x32xf32, #tpu.memory_space<vmem>>, %arg9: memref<1x32xf32, #tpu.memory_space<vmem>>, %arg10: memref<8x32xf32, #tpu.memory_space<vmem>>, %arg11: memref<8x128xf32, #tpu.memory_space<vmem>>) attributes {dimension_semantics = [#tpu.dimension_semantics<parallel>], iteration_bounds = array<i64: 1>, scalar_prefetch = 0 : i64, scratch_operands = 0 : i64, tpu.core_type = #tpu.core_type<tc>, window_params = [{transform_indices = @transform_0, window_bounds = array<i64: 8, 128>}, {transform_indices = @transform_1, window_bounds = array<i64: 8, 128>}, {pipeline_mode = #tpu.pipeline_mode<synchronous>, transform_indices = @transform_2, window_bounds = array<i64: 128, 128>}, {pipeline_mode = #tpu.pipeline_mode<synchronous>, transform_indices = @transform_3, window_bounds = array<i64: 1, 128>}, {pipeline_mode = #tpu.pipeline_mode<synchronous>, transform_indices = @transform_4, window_bounds = array<i64: 256, 512>}, {pipeline_mode = #tpu.pipeline_mode<synchronous>, transform_indices = @transform_5, window_bounds = array<i64: 1, 512>}, {pipeline_mode = #tpu.pipeline_mode<synchronous>, transform_indices = @transform_6, window_bounds = array<i64: 128, 128>}, {pipeline_mode = #tpu.pipeline_mode<synchronous>, transform_indices = @transform_7, window_bounds = array<i64: 128, 32>}, {pipeline_mode = #tpu.pipeline_mode<synchronous>, transform_indices = @transform_8, window_bounds = array<i64: 1, 32>}, {transform_indices = @transform_9, window_bounds = array<i64: 8, 32>}, {transform_indices = @transform_10, window_bounds = array<i64: 8, 128>}]} {
    %c0 = arith.constant 0 : index
    %c0_0 = arith.constant 0 : index
    %0 = vector.load %arg3[%c0, %c0_0] : memref<128x128xf32, #tpu.memory_space<vmem>>, vector<128x128xf32>
    %c0_1 = arith.constant 0 : index
    %c0_2 = arith.constant 0 : index
    %1 = vector.load %arg5[%c0_1, %c0_2] : memref<256x512xf32, #tpu.memory_space<vmem>>, vector<256x512xf32>
    %c0_3 = arith.constant 0 : index
    %c0_4 = arith.constant 0 : index
    %2 = vector.load %arg7[%c0_3, %c0_4] : memref<128x128xf32, #tpu.memory_space<vmem>>, vector<128x128xf32>
    %c0_5 = arith.constant 0 : index
    %c0_6 = arith.constant 0 : index
    %3 = vector.load %arg8[%c0_5, %c0_6] : memref<128x32xf32, #tpu.memory_space<vmem>>, vector<128x32xf32>
    %c0_7 = arith.constant 0 : index
    %c0_8 = arith.constant 0 : index
    %4 = vector.load %arg4[%c0_7, %c0_8] : memref<1x128xf32, #tpu.memory_space<vmem>>, vector<1x128xf32>
    %c0_9 = arith.constant 0 : index
    %c0_10 = arith.constant 0 : index
    %5 = vector.load %arg6[%c0_9, %c0_10] : memref<1x512xf32, #tpu.memory_space<vmem>>, vector<1x512xf32>
    %c0_11 = arith.constant 0 : index
    %c0_12 = arith.constant 0 : index
    %6 = vector.load %arg9[%c0_11, %c0_12] : memref<1x32xf32, #tpu.memory_space<vmem>>, vector<1x32xf32>
    %c0_13 = arith.constant 0 : index
    %c0_14 = arith.constant 0 : index
    %7 = vector.load %arg1[%c0_13, %c0_14] : memref<8x128xf32, #tpu.memory_space<vmem>>, vector<8x128xf32>
    %cst = arith.constant dense<0.000000e+00> : vector<8x128xf32>
    %8 = tpu.matmul %7, %0, %cst {dimension_numbers = #tpu.dot_dimension_numbers<[1], [0], [0], [1], [0, 0, 1, 1], [], []>} : vector<8x128xf32>, vector<128x128xf32>, vector<8x128xf32> -> vector<8x128xf32>
    %9 = vector.broadcast %4 : vector<1x128xf32> to vector<8x128xf32>
    %10 = arith.addf %8, %9 : vector<8x128xf32>
    %11 = arith.negf %10 : vector<8x128xf32>
    %12 = math.exp %11 : vector<8x128xf32>
    %cst_15 = arith.constant 1.000000e+00 : f32
    %13 = vector.broadcast %cst_15 : f32 to vector<8x128xf32>
    %14 = arith.addf %13, %12 : vector<8x128xf32>
    %15 = arith.divf %13, %14 : vector<8x128xf32>
    %c0_16 = arith.constant 0 : index
    %c0_17 = arith.constant 0 : index
    %16 = vector.load %arg2[%c0_16, %c0_17] : memref<8x128xf32, #tpu.memory_space<vmem>>, vector<8x128xf32>
    %17 = tpu.concatenate %15, %16 in 1 : vector<8x128xf32>, vector<8x128xf32> -> vector<8x256xf32>
    %cst_18 = arith.constant dense<0.000000e+00> : vector<8x512xf32>
    %18 = tpu.matmul %17, %1, %cst_18 {dimension_numbers = #tpu.dot_dimension_numbers<[1], [0], [0], [1], [0, 0, 1, 1], [], []>} : vector<8x256xf32>, vector<256x512xf32>, vector<8x512xf32> -> vector<8x512xf32>
    %19 = vector.broadcast %5 : vector<1x512xf32> to vector<8x512xf32>
    %20 = arith.addf %18, %19 : vector<8x512xf32>
    %21 = vector.extract_strided_slice %20 {offsets = [0, 0], sizes = [8, 128], strides = [1, 1]} : vector<8x512xf32> to vector<8x128xf32>
    %22 = arith.negf %21 : vector<8x128xf32>
    %23 = math.exp %22 : vector<8x128xf32>
    %cst_19 = arith.constant 1.000000e+00 : f32
    %24 = vector.broadcast %cst_19 : f32 to vector<8x128xf32>
    %25 = arith.addf %24, %23 : vector<8x128xf32>
    %26 = arith.divf %24, %25 : vector<8x128xf32>
    %27 = vector.extract_strided_slice %20 {offsets = [0, 128], sizes = [8, 128], strides = [1, 1]} : vector<8x512xf32> to vector<8x128xf32>
    %28 = arith.negf %27 : vector<8x128xf32>
    %29 = math.exp %28 : vector<8x128xf32>
    %cst_20 = arith.constant 1.000000e+00 : f32
    %30 = vector.broadcast %cst_20 : f32 to vector<8x128xf32>
    %31 = arith.addf %30, %29 : vector<8x128xf32>
    %32 = arith.divf %30, %31 : vector<8x128xf32>
    %33 = vector.extract_strided_slice %20 {offsets = [0, 256], sizes = [8, 128], strides = [1, 1]} : vector<8x512xf32> to vector<8x128xf32>
    %34 = vector.extract_strided_slice %20 {offsets = [0, 384], sizes = [8, 128], strides = [1, 1]} : vector<8x512xf32> to vector<8x128xf32>
    %35 = arith.mulf %26, %34 : vector<8x128xf32>
    %36 = arith.addf %33, %35 : vector<8x128xf32>
    %37 = math.tanh %36 : vector<8x128xf32>
    %cst_21 = arith.constant 1.000000e+00 : f32
    %38 = vector.broadcast %cst_21 : f32 to vector<8x128xf32>
    %39 = arith.subf %38, %32 : vector<8x128xf32>
    %40 = arith.mulf %39, %37 : vector<8x128xf32>
    %41 = arith.mulf %32, %16 : vector<8x128xf32>
    %42 = arith.addf %40, %41 : vector<8x128xf32>
    %cst_22 = arith.constant dense<0.000000e+00> : vector<8x128xf32>
    %43 = tpu.matmul %42, %2, %cst_22 {dimension_numbers = #tpu.dot_dimension_numbers<[1], [0], [0], [1], [0, 0, 1, 1], [], []>} : vector<8x128xf32>, vector<128x128xf32>, vector<8x128xf32> -> vector<8x128xf32>
    %cst_23 = arith.constant 2.500000e-01 : f32
    %44 = vector.broadcast %cst_23 : f32 to vector<8x128xf32>
    %45 = arith.mulf %43, %44 : vector<8x128xf32>
    %46 = tpu.concatenate %45, %42 in 1 : vector<8x128xf32>, vector<8x128xf32> -> vector<8x256xf32>
    %cst_24 = arith.constant dense<0.000000e+00> : vector<8x512xf32>
    %47 = tpu.matmul %46, %1, %cst_24 {dimension_numbers = #tpu.dot_dimension_numbers<[1], [0], [0], [1], [0, 0, 1, 1], [], []>} : vector<8x256xf32>, vector<256x512xf32>, vector<8x512xf32> -> vector<8x512xf32>
    %48 = vector.broadcast %5 : vector<1x512xf32> to vector<8x512xf32>
    %49 = arith.addf %47, %48 : vector<8x512xf32>
    %50 = vector.extract_strided_slice %49 {offsets = [0, 0], sizes = [8, 128], strides = [1, 1]} : vector<8x512xf32> to vector<8x128xf32>
    %51 = arith.negf %50 : vector<8x128xf32>
    %52 = math.exp %51 : vector<8x128xf32>
    %cst_25 = arith.constant 1.000000e+00 : f32
    %53 = vector.broadcast %cst_25 : f32 to vector<8x128xf32>
    %54 = arith.addf %53, %52 : vector<8x128xf32>
    %55 = arith.divf %53, %54 : vector<8x128xf32>
    %56 = vector.extract_strided_slice %49 {offsets = [0, 128], sizes = [8, 128], strides = [1, 1]} : vector<8x512xf32> to vector<8x128xf32>
    %57 = arith.negf %56 : vector<8x128xf32>
    %58 = math.exp %57 : vector<8x128xf32>
    %cst_26 = arith.constant 1.000000e+00 : f32
    %59 = vector.broadcast %cst_26 : f32 to vector<8x128xf32>
    %60 = arith.addf %59, %58 : vector<8x128xf32>
    %61 = arith.divf %59, %60 : vector<8x128xf32>
    %62 = vector.extract_strided_slice %49 {offsets = [0, 256], sizes = [8, 128], strides = [1, 1]} : vector<8x512xf32> to vector<8x128xf32>
    %63 = vector.extract_strided_slice %49 {offsets = [0, 384], sizes = [8, 128], strides = [1, 1]} : vector<8x512xf32> to vector<8x128xf32>
    %64 = arith.mulf %55, %63 : vector<8x128xf32>
    %65 = arith.addf %62, %64 : vector<8x128xf32>
    %66 = math.tanh %65 : vector<8x128xf32>
    %cst_27 = arith.constant 1.000000e+00 : f32
    %67 = vector.broadcast %cst_27 : f32 to vector<8x128xf32>
    %68 = arith.subf %67, %61 : vector<8x128xf32>
    %69 = arith.mulf %68, %66 : vector<8x128xf32>
    %70 = arith.mulf %61, %42 : vector<8x128xf32>
    %71 = arith.addf %69, %70 : vector<8x128xf32>
    %cst_28 = arith.constant dense<0.000000e+00> : vector<8x128xf32>
    %72 = tpu.matmul %71, %2, %cst_28 {dimension_numbers = #tpu.dot_dimension_numbers<[1], [0], [0], [1], [0, 0, 1, 1], [], []>} : vector<8x128xf32>, vector<128x128xf32>, vector<8x128xf32> -> vector<8x128xf32>
    %cst_29 = arith.constant 2.500000e-01 : f32
    %73 = vector.broadcast %cst_29 : f32 to vector<8x128xf32>
    %74 = arith.mulf %72, %73 : vector<8x128xf32>
    %75 = tpu.concatenate %74, %71 in 1 : vector<8x128xf32>, vector<8x128xf32> -> vector<8x256xf32>
    %cst_30 = arith.constant dense<0.000000e+00> : vector<8x512xf32>
    %76 = tpu.matmul %75, %1, %cst_30 {dimension_numbers = #tpu.dot_dimension_numbers<[1], [0], [0], [1], [0, 0, 1, 1], [], []>} : vector<8x256xf32>, vector<256x512xf32>, vector<8x512xf32> -> vector<8x512xf32>
    %77 = vector.broadcast %5 : vector<1x512xf32> to vector<8x512xf32>
    %78 = arith.addf %76, %77 : vector<8x512xf32>
    %79 = vector.extract_strided_slice %78 {offsets = [0, 0], sizes = [8, 128], strides = [1, 1]} : vector<8x512xf32> to vector<8x128xf32>
    %80 = arith.negf %79 : vector<8x128xf32>
    %81 = math.exp %80 : vector<8x128xf32>
    %cst_31 = arith.constant 1.000000e+00 : f32
    %82 = vector.broadcast %cst_31 : f32 to vector<8x128xf32>
    %83 = arith.addf %82, %81 : vector<8x128xf32>
    %84 = arith.divf %82, %83 : vector<8x128xf32>
    %85 = vector.extract_strided_slice %78 {offsets = [0, 128], sizes = [8, 128], strides = [1, 1]} : vector<8x512xf32> to vector<8x128xf32>
    %86 = arith.negf %85 : vector<8x128xf32>
    %87 = math.exp %86 : vector<8x128xf32>
    %cst_32 = arith.constant 1.000000e+00 : f32
    %88 = vector.broadcast %cst_32 : f32 to vector<8x128xf32>
    %89 = arith.addf %88, %87 : vector<8x128xf32>
    %90 = arith.divf %88, %89 : vector<8x128xf32>
    %91 = vector.extract_strided_slice %78 {offsets = [0, 256], sizes = [8, 128], strides = [1, 1]} : vector<8x512xf32> to vector<8x128xf32>
    %92 = vector.extract_strided_slice %78 {offsets = [0, 384], sizes = [8, 128], strides = [1, 1]} : vector<8x512xf32> to vector<8x128xf32>
    %93 = arith.mulf %84, %92 : vector<8x128xf32>
    %94 = arith.addf %91, %93 : vector<8x128xf32>
    %95 = math.tanh %94 : vector<8x128xf32>
    %cst_33 = arith.constant 1.000000e+00 : f32
    %96 = vector.broadcast %cst_33 : f32 to vector<8x128xf32>
    %97 = arith.subf %96, %90 : vector<8x128xf32>
    %98 = arith.mulf %97, %95 : vector<8x128xf32>
    %99 = arith.mulf %90, %71 : vector<8x128xf32>
    %100 = arith.addf %98, %99 : vector<8x128xf32>
    %cst_34 = arith.constant dense<0.000000e+00> : vector<8x32xf32>
    %101 = tpu.matmul %100, %3, %cst_34 {dimension_numbers = #tpu.dot_dimension_numbers<[1], [0], [0], [1], [0, 0, 1, 1], [], []>} : vector<8x128xf32>, vector<128x32xf32>, vector<8x32xf32> -> vector<8x32xf32>
    %102 = vector.broadcast %6 : vector<1x32xf32> to vector<8x32xf32>
    %103 = arith.addf %101, %102 : vector<8x32xf32>
    %c0_35 = arith.constant 0 : index
    %c0_36 = arith.constant 0 : index
    %104 = vector.load %arg10[%c0_35, %c0_36] : memref<8x32xf32, #tpu.memory_space<vmem>>, vector<8x32xf32>
    tpu.vector_store %arg10[%c0_35, %c0_36], %103 {strides = array<i32>} : memref<8x32xf32, #tpu.memory_space<vmem>>, vector<8x32xf32>,
    %c0_37 = arith.constant 0 : index
    %c0_38 = arith.constant 0 : index
    %105 = vector.load %arg11[%c0_37, %c0_38] : memref<8x128xf32, #tpu.memory_space<vmem>>, vector<8x128xf32>
    tpu.vector_store %arg11[%c0_37, %c0_38], %100 {strides = array<i32>} : memref<8x128xf32, #tpu.memory_space<vmem>>, vector<8x128xf32>,
    return
  }
  func.func @transform_0(%arg0: i32) -> (i32, i32) {
    %c0_i32 = arith.constant 0 : i32
    %c0_i32_0 = arith.constant 0 : i32
    return %arg0, %c0_i32 : i32, i32
  }
  func.func @transform_1(%arg0: i32) -> (i32, i32) {
    %c0_i32 = arith.constant 0 : i32
    %c0_i32_0 = arith.constant 0 : i32
    return %arg0, %c0_i32 : i32, i32
  }
  func.func @transform_2(%arg0: i32) -> (i32, i32) {
    %c0_i32 = arith.constant 0 : i32
    %c0_i32_0 = arith.constant 0 : i32
    %c0_i32_1 = arith.constant 0 : i32
    return %c0_i32, %c0_i32_0 : i32, i32
  }
  func.func @transform_3(%arg0: i32) -> (i32, i32) {
    %c0_i32 = arith.constant 0 : i32
    %c0_i32_0 = arith.constant 0 : i32
    %c0_i32_1 = arith.constant 0 : i32
    return %c0_i32, %c0_i32_0 : i32, i32
  }
  func.func @transform_4(%arg0: i32) -> (i32, i32) {
    %c0_i32 = arith.constant 0 : i32
    %c0_i32_0 = arith.constant 0 : i32
    %c0_i32_1 = arith.constant 0 : i32
    return %c0_i32, %c0_i32_0 : i32, i32
  }
  func.func @transform_5(%arg0: i32) -> (i32, i32) {
    %c0_i32 = arith.constant 0 : i32
    %c0_i32_0 = arith.constant 0 : i32
    %c0_i32_1 = arith.constant 0 : i32
    return %c0_i32, %c0_i32_0 : i32, i32
  }
  func.func @transform_6(%arg0: i32) -> (i32, i32) {
    %c0_i32 = arith.constant 0 : i32
    %c0_i32_0 = arith.constant 0 : i32
    %c0_i32_1 = arith.constant 0 : i32
    return %c0_i32, %c0_i32_0 : i32, i32
  }
  func.func @transform_7(%arg0: i32) -> (i32, i32) {
    %c0_i32 = arith.constant 0 : i32
    %c0_i32_0 = arith.constant 0 : i32
    %c0_i32_1 = arith.constant 0 : i32
    return %c0_i32, %c0_i32_0 : i32, i32
  }
  func.func @transform_8(%arg0: i32) -> (i32, i32) {
    %c0_i32 = arith.constant 0 : i32
    %c0_i32_0 = arith.constant 0 : i32
    %c0_i32_1 = arith.constant 0 : i32
    return %c0_i32, %c0_i32_0 : i32, i32
  }
  func.func @transform_9(%arg0: i32) -> (i32, i32) {
    %c0_i32 = arith.constant 0 : i32
    %c0_i32_0 = arith.constant 0 : i32
    return %arg0, %c0_i32 : i32, i32
  }
  func.func @transform_10(%arg0: i32) -> (i32, i32) {
    %c0_i32 = arith.constant 0 : i32
    %c0_i32_0 = arith.constant 0 : i32
    return %arg0, %c0_i32 : i32, i32
  }
}

</mosaic_0001>

<bundles_post_ra>
// kernel: tpu_custom_call.1
= control target key start
LH: loop header
LB: loop body
LE: loop exit
PB: predicated region body
PF: predicated region fallthrough
CT: control target
= control target key end

     0   :  { %16 = vsyncpa [#allocation3], 0  ;;  %s2432_s0 = inlined_call_operand.vmem [shape: f32[8,128], index: 0, kind: input, shape index: {}]   ;;  %s2433_s1 = inlined_call_operand.vmem [shape: f32[8,128], index: 1, kind: input, shape index: {}]   ;;  %s2434_s2 = inlined_call_operand.vmem [shape: f32[128,128], index: 2, kind: input, shape index: {}]   ;;  %s2435_s3 = inlined_call_operand.vmem [shape: f32[1,128], index: 3, kind: input, shape index: {}]   ;;  %s2436_s4 = inlined_call_operand.hbm [shape: f32[256,512], index: 4, kind: input, shape index: {}]   ;;  %s2437_s5 = inlined_call_operand.vmem [shape: f32[1,512], index: 5, kind: input, shape index: {}]   ;;  %s2438_s6 = inlined_call_operand.hbm [shape: f32[128,128], index: 6, kind: input, shape index: {}]   ;;  %s2439_s7 = inlined_call_operand.vmem [shape: f32[128,32], index: 7, kind: input, shape index: {}]   ;;  %s2440_s8 = inlined_call_operand.vmem [shape: f32[1,32], index: 8, kind: input, shape index: {}]   ;;  %s2441_s9 = inlined_call_operand.hbm [shape: f32[8,32], index: 9, kind: output, shape index: {0}]   ;;  %s2442_s10 = inlined_call_operand.hbm [shape: f32[8,128], index: 10, kind: output, shape index: {1}]  }
   0x1   :  { %17 = vsyncpa [#allocation6], 0 }
   0x2   :  { %18 = vsyncpa [#allocation4], 0 }
   0x3   :  { %19 = vsyncpa [#allocation9], 0  ;;  %s1490_s13 = smov [#allocation2]  }
   0x4   :  { %s33_s14 = sshll.u32 %s1490_s13, 4  ;;  %s34_s14 = int_to_ptr.vmem [resolvable:$true] %s33_s14 }
   0x5   :  { %s1410_s15 = scalar_lea.vmem %s34_s14, 16384  ;;  %p1415_p1 = scmp.lt.s32.totalorder %s34_s14, %s34_s14 }
   0x6   :  { %p1411_p0 = scmp.ne.s32.totalorder %s34_s14, %s1410_s15  ;;  %p1416_p2 = scmp.lt.s32.totalorder %s1410_s15, %s1410_s15 }
   0x8   :  { %p1417_p3 = por %p1416_p2, %p1415_p1 }
   0xa   :  { %p1418_p4 = pnand %p1417_p3, %p1411_p0 }
   0xc   :  { %1421 = shalt.err (!%p1418_p4)
}
   0xd   :  { %s1491_s16 = smov 512   ;;  %s1492_s17 = smov 32  }
   0xe   :  { %39 = dma.hbm_to_vmem [thread:$0]  %s2436_s4, 16384, %s34_s14, [#allocation3], %s1491_s16, %s1491_s16, %s1492_s17  }
   0xf   :  { %s1493_s20 = smov [#allocation5]  }
  0x10   :  { %s47_s21 = sshll.u32 %s1493_s20, 4  ;;  %s48_s21 = int_to_ptr.vmem [resolvable:$true] %s47_s21 }
  0x11   :  { %s1430_s22 = scalar_lea.vmem %s48_s21, 2048  ;;  %p1435_p6 = scmp.lt.s32.totalorder %s48_s21, %s48_s21 }
  0x12   :  { %p1431_p5 = scmp.ne.s32.totalorder %s48_s21, %s1430_s22  ;;  %p1436_p7 = scmp.lt.s32.totalorder %s1430_s22, %s1430_s22 }
  0x14   :  { %p1437_p8 = por %p1436_p7, %p1435_p6 }
  0x16   :  { %p1438_p9 = pnand %p1437_p8, %p1431_p5 }
  0x18   :  { %1441 = shalt.err (!%p1438_p9)
}
  0x19   :  { %s1494_s23 = smov 128   ;;  %s1495_s24 = smov 8  }
  0x1a   :  { %53 = dma.hbm_to_vmem [thread:$0]  %s2438_s6, 2048, %s48_s21, [#allocation6], %s1494_s23, %s1494_s23, %s1495_s24  }
  0x1b   :  { %1482 = dma.done.wait [#allocation3], 16384  }
  0x1c   :  { %1483 = vsyncadd [#allocation3], 4294950912 }
  0x1d   :  { %1484 = dma.done.wait [#allocation6], 2048  }
  0x1e   :  { %1485 = vsyncadd [#allocation6], 4294965248  ;;  %v2443_v0 = vmov 0.0   ;;  %vm1497_vm0 = vmmov 0   ;;  %v79_v1 = vld [vmem:[%s2434_s2 + $0x78] sm:$0xff]  ;;  %v78_v2 = vld [vmem:[%s2434_s2 + $0x70] sm:$0xff] }
  0x1f   :  { %1159 = vmatprep.subr.mxu0 %v2443_v0  ;;  %1191 = vmatprep.mubr.msk.f32.mxu0 %vm1497_vm0, %v2443_v0  ;;  %v77_v3 = vld [vmem:[%s2434_s2 + $0x68] sm:$0xff]  ;;  %v76_v4 = vld [vmem:[%s2434_s2 + $0x60] sm:$0xff]  ;;  %v75_v6 = vld [vmem:[%s2434_s2 + $0x58] sm:$0xff] }
  0x20   :  { %1160 = vmatpush3.msra.mxu0 %v79_v1  ;;  %v1578_v5 = vld [vmem:[#allocation2 + $0x1e8] sm:$0xff]  ;;  %v1585_v7 = vld [vmem:[#allocation2 + $0x1e0] sm:$0xff]  ;;  %v74_v10 = vld [vmem:[%s2434_s2 + $0x50] sm:$0xff] }
  0x21   :  { %1161 = vmatprep.subr.mxu0 %v2443_v0  ;;  %348 = vmatprep.subr.mxu1 %v1578_v5  ;;  %v1588_v8 = vld [vmem:[#allocation2 + $0x1c8] sm:$0xff]  ;;  %v1590_v9 = vld [vmem:[#allocation2 + $0x1c0] sm:$0xff]  ;;  %v71_v20 = vld [vmem:[%s2434_s2 + $0x38] sm:$0xff] }
  0x22   :  { %1162 = vmatpush3.msra.mxu0 %v78_v2  ;;  %349 = vmatpush1.msra.mxu1 %v1585_v7  ;;  %v1597_v11 = vld [vmem:[#allocation2 + $0x1a8] sm:$0xff]  ;;  %v1600_v12 = vld [vmem:[#allocation2 + $0x1a0] sm:$0xff]  ;;  %v70_v23 = vld [vmem:[%s2434_s2 + $0x30] sm:$0xff] }
  0x23   :  { %1163 = vmatprep.subr.mxu0 %v2443_v0  ;;  %350 = vmatprep.subr.mxu1 %v1588_v8  ;;  %v1602_v13 = vld [vmem:[#allocation2 + $0x188] sm:$0xff]  ;;  %v1609_v15 = vld [vmem:[#allocation2 + $0x180] sm:$0xff]  ;;  %v67_v32 = vld [vmem:[%s2434_s2 + $0x18] sm:$0xff] }
  0x24   :  { %1164 = vmatpush3.msra.mxu0 %v77_v3  ;;  %351 = vmatpush1.msra.mxu1 %v1590_v9  ;;  %v73_v14 = vld [vmem:[%s2434_s2 + $0x48] sm:$0xff]  ;;  %v72_v17 = vld [vmem:[%s2434_s2 + $0x40] sm:$0xff]  ;;  %v66_v35 = vld [vmem:[%s2434_s2 + $0x10] sm:$0xff] }
  0x25   :  { %1165 = vmatprep.subr.mxu0 %v2443_v0  ;;  %352 = vmatprep.subr.mxu1 %v1597_v11  ;;  %v1612_v16 = vld [vmem:[#allocation2 + $0x168] sm:$0xff]  ;;  %v1619_v18 = vld [vmem:[#allocation2 + $0x160] sm:$0xff]  ;;  %v1704_v44 = vld [vmem:[#allocation2 + $0x1f8] sm:$0xff] }
  0x26   :  { %1166 = vmatpush3.msra.mxu0 %v76_v4  ;;  %353 = vmatpush1.msra.mxu1 %v1600_v12  ;;  %v1622_v19 = vld [vmem:[#allocation2 + $0x148] sm:$0xff]  ;;  %v1629_v21 = vld [vmem:[#allocation2 + $0x140] sm:$0xff]  ;;  %2565 = vst [vmem:[#allocation14_spill] sm:$0xff] %v1704_v44  ;;  %v1708_v45 = vld [vmem:[#allocation2 + $0x1f0] sm:$0xff] }
  0x27   :  { %1167 = vmatprep.subr.mxu0 %v2443_v0  ;;  %354 = vmatprep.subr.mxu1 %v1602_v13  ;;  %v1632_v22 = vld [vmem:[#allocation2 + $0x128] sm:$0xff]  ;;  %v1639_v24 = vld [vmem:[#allocation2 + $0x120] sm:$0xff]  ;;  %2566 = vst [vmem:[#allocation15_spill] sm:$0xff] %v1708_v45  ;;  %v1713_v47 = vld [vmem:[#allocation2 + $0x1d8] sm:$0xff] }
  0x28   :  { %1168 = vmatpush3.msra.mxu0 %v75_v6  ;;  %355 = vmatpush1.msra.mxu1 %v1609_v15  ;;  %v1642_v25 = vld [vmem:[#allocation2 + $0x108] sm:$0xff]  ;;  %v1649_v27 = vld [vmem:[#allocation2 + $0x100] sm:$0xff]  ;;  %2567 = vst [vmem:[#allocation16_spill] sm:$0xff] %v1713_v47  ;;  %v1719_v49 = vld [vmem:[#allocation2 + $0x1d0] sm:$0xff] }
  0x29   :  { %1169 = vmatprep.subr.mxu0 %v2443_v0  ;;  %356 = vmatprep.subr.mxu1 %v1612_v16  ;;  %v69_v26 = vld [vmem:[%s2434_s2 + $0x28] sm:$0xff]  ;;  %v68_v29 = vld [vmem:[%s2434_s2 + $0x20] sm:$0xff]  ;;  %2568 = vst [vmem:[#allocation17_spill] sm:$0xff] %v1719_v49  ;;  %v1724_v51 = vld [vmem:[#allocation2 + $0x1b8] sm:$0xff] }
  0x2a   :  { %1170 = vmatpush3.msra.mxu0 %v74_v10  ;;  %357 = vmatpush1.msra.mxu1 %v1619_v18  ;;  %v1652_v28 = vld [vmem:[#allocation2 + $0xe8] sm:$0xff]  ;;  %v1659_v30 = vld [vmem:[#allocation2 + $0xe0] sm:$0xff]  ;;  %2569 = vst [vmem:[#allocation18_spill] sm:$0xff] %v1724_v51  ;;  %v1728_v52 = vld [vmem:[#allocation2 + $0x1b0] sm:$0xff] }
  0x2b   :  { %1171 = vmatprep.subr.mxu0 %v2443_v0  ;;  %358 = vmatprep.subr.mxu1 %v1622_v19  ;;  %v1662_v31 = vld [vmem:[#allocation2 + $0xc8] sm:$0xff]  ;;  %v1669_v33 = vld [vmem:[#allocation2 + $0xc0] sm:$0xff]  ;;  %2570 = vst [vmem:[#allocation19_spill] sm:$0xff] %v1728_v52  ;;  %v1732_v53 = vld [vmem:[#allocation2 + $0x198] sm:$0xff] }
  0x2c   :  { %1172 = vmatpush3.msra.mxu0 %v73_v14  ;;  %359 = vmatpush1.msra.mxu1 %v1629_v21  ;;  %v1672_v34 = vld [vmem:[#allocation2 + $0xa8] sm:$0xff]  ;;  %v1679_v36 = vld [vmem:[#allocation2 + $0xa0] sm:$0xff]  ;;  %2571 = vst [vmem:[#allocation20_spill] sm:$0xff] %v1732_v53  ;;  %v1736_v54 = vld [vmem:[#allocation2 + $0x190] sm:$0xff] }
  0x2d   :  { %1173 = vmatprep.subr.mxu0 %v2443_v0  ;;  %360 = vmatprep.subr.mxu1 %v1632_v22  ;;  %v1682_v37 = vld [vmem:[#allocation2 + $0x88] sm:$0xff]  ;;  %v1689_v39 = vld [vmem:[#allocation2 + $0x80] sm:$0xff]  ;;  %2572 = vst [vmem:[#allocation21_spill] sm:$0xff] %v1736_v54  ;;  %v1739_v55 = vld [vmem:[#allocation2 + $0x178] sm:$0xff] }
  0x2e   :  { %1174 = vmatpush3.msra.mxu0 %v72_v17  ;;  %361 = vmatpush1.msra.mxu1 %v1639_v24  ;;  %v65_v38 = vld [vmem:[%s2434_s2 + $0x8] sm:$0xff]  ;;  %v64_v41 = vld [vmem:[%s2434_s2] sm:$0xff]  ;;  %2573 = vst [vmem:[#allocation22_spill] sm:$0xff] %v1739_v55  ;;  %v1742_v56 = vld [vmem:[#allocation2 + $0x170] sm:$0xff] }
  0x2f   :  { %1175 = vmatprep.subr.mxu0 %v2443_v0  ;;  %362 = vmatprep.subr.mxu1 %v1642_v25  ;;  %v1692_v40 = vld [vmem:[#allocation2 + $0x68] sm:$0xff]  ;;  %v1699_v42 = vld [vmem:[#allocation2 + $0x60] sm:$0xff]  ;;  %2574 = vst [vmem:[#allocation23_spill] sm:$0xff] %v1742_v56  ;;  %v1745_v57 = vld [vmem:[#allocation2 + $0x158] sm:$0xff] }
  0x30   :  { %1176 = vmatpush3.msra.mxu0 %v71_v20  ;;  %363 = vmatpush1.msra.mxu1 %v1649_v27  ;;  %v243_v43 = vld [vmem:[%s2432_s0] sm:$0xff]  ;;  %v1711_v46 = vld [vmem:[#allocation2 + $0x48] sm:$0xff]  ;;  %2575 = vst [vmem:[#allocation24_spill] sm:$0xff] %v1745_v57  ;;  %v1748_v58 = vld [vmem:[#allocation2 + $0x150] sm:$0xff] }
  0x31   :  { %1177 = vmatprep.subr.mxu0 %v2443_v0  ;;  %364 = vmatprep.subr.mxu1 %v1652_v28  ;;  %v1716_v48 = vld [vmem:[#allocation2 + $0x40] sm:$0xff]  ;;  %v1721_v50 = vld [vmem:[#allocation2 + $0x28] sm:$0xff]  ;;  %2576 = vst [vmem:[#allocation25_spill] sm:$0xff] %v1748_v58  ;;  %v1751_v59 = vld [vmem:[#allocation2 + $0x138] sm:$0xff] }
  0x32   :  { %1178 = vmatpush3.msra.mxu0 %v70_v23  ;;  %365 = vmatpush1.msra.mxu1 %v1659_v30  ;;  %2577 = vst [vmem:[#allocation26_spill] sm:$0xff] %v1751_v59  ;;  %v1754_v60 = vld [vmem:[#allocation2 + $0x130] sm:$0xff]  ;;  %v1757_v61 = vld [vmem:[#allocation2 + $0x118] sm:$0xff] }
  0x33   :  { %1179 = vmatprep.subr.mxu0 %v2443_v0  ;;  %366 = vmatprep.subr.mxu1 %v1662_v31  ;;  %2578 = vst [vmem:[#allocation27_spill] sm:$0xff] %v1754_v60  ;;  %2579 = vst [vmem:[#allocation28_spill] sm:$0xff] %v1757_v61  ;;  %v1760_v62 = vld [vmem:[#allocation2 + $0x110] sm:$0xff]  ;;  %v1763_v63 = vld [vmem:[#allocation2 + $0xf8] sm:$0xff] }
  0x34   :  { %1180 = vmatpush3.msra.mxu0 %v69_v26  ;;  %367 = vmatpush1.msra.mxu1 %v1669_v33  ;;  %2580 = vst [vmem:[#allocation29_spill] sm:$0xff] %v1760_v62  ;;  %2581 = vst [vmem:[#allocation30_spill] sm:$0xff] %v1763_v63  ;;  %v1766_v1 = vld [vmem:[#allocation2 + $0xf0] sm:$0xff]  ;;  %v1769_v2 = vld [vmem:[#allocation2 + $0xd8] sm:$0xff] }
  0x35   :  { %1181 = vmatprep.subr.mxu0 %v2443_v0  ;;  %368 = vmatprep.subr.mxu1 %v1672_v34  ;;  %2582 = vst [vmem:[#allocation31_spill] sm:$0xff] %v1766_v1  ;;  %2583 = vst [vmem:[#allocation32_spill] sm:$0xff] %v1769_v2  ;;  %v1772_v3 = vld [vmem:[#allocation2 + $0xd0] sm:$0xff]  ;;  %v1775_v4 = vld [vmem:[#allocation2 + $0xb8] sm:$0xff] }
  0x36   :  { %1182 = vmatpush3.msra.mxu0 %v68_v29  ;;  %369 = vmatpush1.msra.mxu1 %v1679_v36  ;;  %2584 = vst [vmem:[#allocation33_spill] sm:$0xff] %v1772_v3  ;;  %2585 = vst [vmem:[#allocation34_spill] sm:$0xff] %v1775_v4  ;;  %v1778_v6 = vld [vmem:[#allocation2 + $0xb0] sm:$0xff]  ;;  %v1781_v10 = vld [vmem:[#allocation2 + $0x98] sm:$0xff] }
  0x37   :  { %1183 = vmatprep.subr.mxu0 %v2443_v0  ;;  %370 = vmatprep.subr.mxu1 %v1682_v37  ;;  %2586 = vst [vmem:[#allocation35_spill] sm:$0xff] %v1778_v6  ;;  %2587 = vst [vmem:[#allocation36_spill] sm:$0xff] %v1781_v10  ;;  %v1784_v14 = vld [vmem:[#allocation2 + $0x90] sm:$0xff]  ;;  %v1787_v17 = vld [vmem:[#allocation2 + $0x78] sm:$0xff] }
  0x38   :  { %1184 = vmatpush3.msra.mxu0 %v67_v32  ;;  %371 = vmatpush1.msra.mxu1 %v1689_v39  ;;  %2588 = vst [vmem:[#allocation37_spill] sm:$0xff] %v1784_v14  ;;  %2589 = vst [vmem:[#allocation38_spill] sm:$0xff] %v1787_v17  ;;  %v1790_v20 = vld [vmem:[#allocation2 + $0x70] sm:$0xff]  ;;  %v1793_v23 = vld [vmem:[#allocation2 + $0x58] sm:$0xff] }
  0x39   :  { %1185 = vmatprep.subr.mxu0 %v2443_v0  ;;  %372 = vmatprep.subr.mxu1 %v1692_v40  ;;  %2590 = vst [vmem:[#allocation39_spill] sm:$0xff] %v1790_v20  ;;  %2591 = vst [vmem:[#allocation40_spill] sm:$0xff] %v1793_v23  ;;  %v1796_v26 = vld [vmem:[#allocation2 + $0x50] sm:$0xff]  ;;  %v1799_v29 = vld [vmem:[#allocation2 + $0x38] sm:$0xff] }
  0x3a   :  { %1186 = vmatpush3.msra.mxu0 %v66_v35  ;;  %373 = vmatpush1.msra.mxu1 %v1699_v42  ;;  %2592 = vst [vmem:[#allocation41_spill] sm:$0xff] %v1796_v26  ;;  %2593 = vst [vmem:[#allocation42_spill] sm:$0xff] %v1799_v29  ;;  %v1804_v32 = vld [vmem:[#allocation2 + $0x20] sm:$0xff]  ;;  %v1806_v35 = vld [vmem:[#allocation2 + $0x30] sm:$0xff] }
  0x3b   :  { %1187 = vmatprep.subr.mxu0 %v2443_v0  ;;  %374 = vmatprep.subr.mxu1 %v1711_v46  ;;  %2594 = vst [vmem:[#allocation43_spill] sm:$0xff] %v1806_v35 }
  0x3c   :  { %1188 = vmatpush3.msra.mxu0 %v65_v38  ;;  %375 = vmatpush1.msra.mxu1 %v1716_v48  ;;  %v1810_v38 = vld [vmem:[#allocation2 + $0x8] sm:$0xff] }
  0x3d   :  { %1189 = vmatprep.subr.mxu0 %v2443_v0  ;;  %376 = vmatprep.subr.mxu1 %v1721_v50  ;;  %v1818_v0 = vld [vmem:[#allocation2 + $0x10] sm:$0xff] }
  0x3e   :  { %1190 = vmatpush3.msra.mxu0 %v64_v41  ;;  %377 = vmatpush1.msra.mxu1 %v1804_v32  ;;  %v1812_v41 = vld [vmem:[#allocation2 + $0x18] sm:$0xff]  ;;  %2596 = vst [vmem:[#allocation45_spill] sm:$0xff] %v1818_v0 }
  0x3f   :  { %1192 = vmatmul.mubr.f32.vlgmr.msra.gmra.mxu0 %v243_v43  ;;  %419 = vmatprep.subr.mxu0 %v1704_v44  ;;  %2595 = vst [vmem:[#allocation44_spill] sm:$0xff] %v1812_v41  ;;  %v1816_v43 = vld [vmem:[#allocation2] sm:$0xff]  ;;  %v1974_v44 = vld [vmem:[#allocation2 + $0x248] sm:$0xff] }
  0x40   :  { %420 = vmatpush1.msra.mxu0 %v1708_v45  ;;  %378 = vmatprep.subr.mxu1 %v1810_v38  ;;  %v1970_v45 = vld [vmem:[#allocation2 + $0x270] sm:$0xff]  ;;  %2634 = vst [vmem:[#allocation83_spill] sm:$0xff] %v1974_v44 }
  0x41   :  { %421 = vmatprep.subr.mxu0 %v1713_v47  ;;  %379 = vmatpush1.msra.mxu1 %v1816_v43  ;;  %v1964_v47 = vld [vmem:[#allocation2 + $0x278] sm:$0xff]  ;;  %2633 = vst [vmem:[#allocation82_spill] sm:$0xff] %v1970_v45 }
  0x42   :  { %422 = vmatpush1.msra.mxu0 %v1719_v49  ;;  %v1962_v49 = vld [vmem:[#allocation2 + $0x268] sm:$0xff]  ;;  %2631 = vst [vmem:[#allocation80_spill] sm:$0xff] %v1964_v47 }
  0x43   :  { %423 = vmatprep.subr.mxu0 %v1724_v51  ;;  %v1956_v51 = vld [vmem:[#allocation2 + $0x280] sm:$0xff]  ;;  %2630 = vst [vmem:[#allocation79_spill] sm:$0xff] %v1962_v49 }
  0x44   :  { %424 = vmatpush1.msra.mxu0 %v1728_v52  ;;  %v1954_v52 = vld [vmem:[#allocation2 + $0x298] sm:$0xff]  ;;  %2628 = vst [vmem:[#allocation77_spill] sm:$0xff] %v1956_v51 }
  0x45   :  { %425 = vmatprep.subr.mxu0 %v1732_v53  ;;  %v1948_v53 = vld [vmem:[#allocation2 + $0x2b0] sm:$0xff]  ;;  %2627 = vst [vmem:[#allocation76_spill] sm:$0xff] %v1954_v52 }
  0x46   :  { %426 = vmatpush1.msra.mxu0 %v1736_v54  ;;  %v1944_v54 = vld [vmem:[#allocation2 + $0x2b8] sm:$0xff]  ;;  %2625 = vst [vmem:[#allocation74_spill] sm:$0xff] %v1948_v53 }
  0x47   :  { %427 = vmatprep.subr.mxu0 %v1739_v55  ;;  %v1938_v55 = vld [vmem:[#allocation2 + $0x2d0] sm:$0xff]  ;;  %2623 = vst [vmem:[#allocation72_spill] sm:$0xff] %v1944_v54 }
  0x48   :  { %428 = vmatpush1.msra.mxu0 %v1742_v56  ;;  %v1932_v56 = vld [vmem:[#allocation2 + $0x2d8] sm:$0xff]  ;;  %2621 = vst [vmem:[#allocation70_spill] sm:$0xff] %v1938_v55 }
  0x49   :  { %429 = vmatprep.subr.mxu0 %v1745_v57  ;;  %v1926_v57 = vld [vmem:[#allocation2 + $0x2f0] sm:$0xff]  ;;  %2619 = vst [vmem:[#allocation68_spill] sm:$0xff] %v1932_v56 }
  0x4a   :  { %430 = vmatpush1.msra.mxu0 %v1748_v58  ;;  %v1920_v58 = vld [vmem:[#allocation2 + $0x2f8] sm:$0xff]  ;;  %2617 = vst [vmem:[#allocation66_spill] sm:$0xff] %v1926_v57 }
  0x4b   :  { %431 = vmatprep.subr.mxu0 %v1751_v59  ;;  %v1914_v59 = vld [vmem:[#allocation2 + $0x310] sm:$0xff]  ;;  %2615 = vst [vmem:[#allocation64_spill] sm:$0xff] %v1920_v58 }
  0x4c   :  { %432 = vmatpush1.msra.mxu0 %v1754_v60  ;;  %v1908_v60 = vld [vmem:[#allocation2 + $0x318] sm:$0xff]  ;;  %2613 = vst [vmem:[#allocation62_spill] sm:$0xff] %v1914_v59 }
  0x4d   :  { %433 = vmatprep.subr.mxu0 %v1757_v61  ;;  %v1902_v61 = vld [vmem:[#allocation2 + $0x330] sm:$0xff]  ;;  %2611 = vst [vmem:[#allocation60_spill] sm:$0xff] %v1908_v60 }
  0x4e   :  { %434 = vmatpush1.msra.mxu0 %v1760_v62  ;;  %v1896_v62 = vld [vmem:[#allocation2 + $0x338] sm:$0xff]  ;;  %2610 = vst [vmem:[#allocation59_spill] sm:$0xff] %v1902_v61 }
  0x4f   :  { %435 = vmatprep.subr.mxu0 %v1763_v63  ;;  %v1890_v63 = vld [vmem:[#allocation2 + $0x350] sm:$0xff]  ;;  %2609 = vst [vmem:[#allocation58_spill] sm:$0xff] %v1896_v62 }
  0x50   :  { %436 = vmatpush1.msra.mxu0 %v1766_v1  ;;  %v1884_v1 = vld [vmem:[#allocation2 + $0x358] sm:$0xff]  ;;  %2608 = vst [vmem:[#allocation57_spill] sm:$0xff] %v1890_v63 }
  0x51   :  { %437 = vmatprep.subr.mxu0 %v1769_v2  ;;  %v1878_v2 = vld [vmem:[#allocation2 + $0x370] sm:$0xff]  ;;  %2607 = vst [vmem:[#allocation56_spill] sm:$0xff] %v1884_v1 }
  0x52   :  { %438 = vmatpush1.msra.mxu0 %v1772_v3  ;;  %v1872_v3 = vld [vmem:[#allocation2 + $0x378] sm:$0xff]  ;;  %2606 = vst [vmem:[#allocation55_spill] sm:$0xff] %v1878_v2 }
  0x53   :  { %439 = vmatprep.subr.mxu0 %v1775_v4  ;;  %v1866_v4 = vld [vmem:[#allocation2 + $0x390] sm:$0xff]  ;;  %2605 = vst [vmem:[#allocation54_spill] sm:$0xff] %v1872_v3 }
  0x54   :  { %440 = vmatpush1.msra.mxu0 %v1778_v6  ;;  %v1860_v6 = vld [vmem:[#allocation2 + $0x398] sm:$0xff]  ;;  %2604 = vst [vmem:[#allocation53_spill] sm:$0xff] %v1866_v4 }
  0x55   :  { %441 = vmatprep.subr.mxu0 %v1781_v10  ;;  %v1854_v10 = vld [vmem:[#allocation2 + $0x3b0] sm:$0xff]  ;;  %2603 = vst [vmem:[#allocation52_spill] sm:$0xff] %v1860_v6 }
  0x56   :  { %442 = vmatpush1.msra.mxu0 %v1784_v14  ;;  %v1848_v14 = vld [vmem:[#allocation2 + $0x3b8] sm:$0xff]  ;;  %2602 = vst [vmem:[#allocation51_spill] sm:$0xff] %v1854_v10 }
  0x57   :  { %443 = vmatprep.subr.mxu0 %v1787_v17  ;;  %v1842_v17 = vld [vmem:[#allocation2 + $0x3d0] sm:$0xff]  ;;  %2601 = vst [vmem:[#allocation50_spill] sm:$0xff] %v1848_v14 }
  0x58   :  { %444 = vmatpush1.msra.mxu0 %v1790_v20  ;;  %v1836_v20 = vld [vmem:[#allocation2 + $0x3d8] sm:$0xff]  ;;  %2600 = vst [vmem:[#allocation49_spill] sm:$0xff] %v1842_v17 }
  0x59   :  { %445 = vmatprep.subr.mxu0 %v1793_v23  ;;  %v1830_v23 = vld [vmem:[#allocation2 + $0x3f0] sm:$0xff]  ;;  %2599 = vst [vmem:[#allocation48_spill] sm:$0xff] %v1836_v20 }
  0x5a   :  { %446 = vmatpush1.msra.mxu0 %v1796_v26  ;;  %v1824_v26 = vld [vmem:[#allocation2 + $0x3f8] sm:$0xff]  ;;  %2598 = vst [vmem:[#allocation47_spill] sm:$0xff] %v1830_v23 }
  0x5b   :  { %447 = vmatprep.subr.mxu0 %v1799_v29  ;;  %v1822_v29 = vld [vmem:[#allocation2 + $0x3e8] sm:$0xff]  ;;  %2597 = vst [vmem:[#allocation46_spill] sm:$0xff] %v1824_v26 }
  0x5c   :  { %448 = vmatpush1.msra.mxu0 %v1806_v35  ;;  %380 = vmatprep.subr.mxu1 %v1822_v29  ;;  %v1828_v35 = vld [vmem:[#allocation2 + $0x3e0] sm:$0xff] }
  0x5d   :  { %449 = vmatprep.subr.mxu0 %v1812_v41  ;;  %381 = vmatpush2.msra.mxu1 %v1828_v35  ;;  %v1834_v41 = vld [vmem:[#allocation2 + $0x3c8] sm:$0xff] }
  0x5e   :  { %450 = vmatpush1.msra.mxu0 %v1818_v0  ;;  %382 = vmatprep.subr.mxu1 %v1834_v41  ;;  %v1840_v0 = vld [vmem:[#allocation2 + $0x3c0] sm:$0xff] }
  0x5f   :  { %451 = vmatprep.subr.mxu0 %v1824_v26  ;;  %383 = vmatpush2.msra.mxu1 %v1840_v0  ;;  %v1846_v26 = vld [vmem:[#allocation2 + $0x3a8] sm:$0xff] }
  0x60   :  { %452 = vmatpush2.msra.mxu0 %v1830_v23  ;;  %384 = vmatprep.subr.mxu1 %v1846_v26  ;;  %v1852_v23 = vld [vmem:[#allocation2 + $0x3a0] sm:$0xff] }
  0x61   :  { %453 = vmatprep.subr.mxu0 %v1836_v20  ;;  %385 = vmatpush2.msra.mxu1 %v1852_v23  ;;  %v1858_v20 = vld [vmem:[#allocation2 + $0x388] sm:$0xff] }
  0x62   :  { %454 = vmatpush2.msra.mxu0 %v1842_v17  ;;  %386 = vmatprep.subr.mxu1 %v1858_v20  ;;  %v1864_v17 = vld [vmem:[#allocation2 + $0x380] sm:$0xff] }
  0x63   :  { %455 = vmatprep.subr.mxu0 %v1848_v14  ;;  %387 = vmatpush2.msra.mxu1 %v1864_v17  ;;  %v1870_v14 = vld [vmem:[#allocation2 + $0x368] sm:$0xff] }
  0x64   :  { %456 = vmatpush2.msra.mxu0 %v1854_v10  ;;  %388 = vmatprep.subr.mxu1 %v1870_v14  ;;  %v1876_v10 = vld [vmem:[#allocation2 + $0x360] sm:$0xff] }
  0x65   :  { %457 = vmatprep.subr.mxu0 %v1860_v6  ;;  %389 = vmatpush2.msra.mxu1 %v1876_v10  ;;  %v1882_v6 = vld [vmem:[#allocation2 + $0x348] sm:$0xff] }
  0x66   :  { %458 = vmatpush2.msra.mxu0 %v1866_v4  ;;  %390 = vmatprep.subr.mxu1 %v1882_v6  ;;  %v1888_v4 = vld [vmem:[#allocation2 + $0x340] sm:$0xff] }
  0x67   :  { %459 = vmatprep.subr.mxu0 %v1872_v3  ;;  %391 = vmatpush2.msra.mxu1 %v1888_v4  ;;  %v1894_v3 = vld [vmem:[#allocation2 + $0x328] sm:$0xff] }
  0x68   :  { %460 = vmatpush2.msra.mxu0 %v1878_v2  ;;  %392 = vmatprep.subr.mxu1 %v1894_v3  ;;  %v1900_v2 = vld [vmem:[#allocation2 + $0x320] sm:$0xff] }
  0x69   :  { %461 = vmatprep.subr.mxu0 %v1884_v1  ;;  %393 = vmatpush2.msra.mxu1 %v1900_v2  ;;  %v1906_v1 = vld [vmem:[#allocation2 + $0x308] sm:$0xff] }
  0x6a   :  { %462 = vmatpush2.msra.mxu0 %v1890_v63  ;;  %394 = vmatprep.subr.mxu1 %v1906_v1  ;;  %v1912_v63 = vld [vmem:[#allocation2 + $0x300] sm:$0xff] }
  0x6b   :  { %463 = vmatprep.subr.mxu0 %v1896_v62  ;;  %2612 = vst [vmem:[#allocation61_spill] sm:$0xff] %v1912_v63  ;;  %395 = vmatpush2.msra.mxu1 %v1912_v63  ;;  %v1918_v62 = vld [vmem:[#allocation2 + $0x2e8] sm:$0xff] }
  0x6c   :  { %464 = vmatpush2.msra.mxu0 %v1902_v61  ;;  %2614 = vst [vmem:[#allocation63_spill] sm:$0xff] %v1918_v62  ;;  %396 = vmatprep.subr.mxu1 %v1918_v62  ;;  %v1924_v61 = vld [vmem:[#allocation2 + $0x2e0] sm:$0xff] }
  0x6d   :  { %465 = vmatprep.subr.mxu0 %v1908_v60  ;;  %2616 = vst [vmem:[#allocation65_spill] sm:$0xff] %v1924_v61  ;;  %397 = vmatpush2.msra.mxu1 %v1924_v61  ;;  %v1930_v60 = vld [vmem:[#allocation2 + $0x2c8] sm:$0xff] }
  0x6e   :  { %466 = vmatpush2.msra.mxu0 %v1914_v59  ;;  %2618 = vst [vmem:[#allocation67_spill] sm:$0xff] %v1930_v60  ;;  %398 = vmatprep.subr.mxu1 %v1930_v60  ;;  %v1936_v59 = vld [vmem:[#allocation2 + $0x2c0] sm:$0xff] }
  0x6f   :  { %467 = vmatprep.subr.mxu0 %v1920_v58  ;;  %2620 = vst [vmem:[#allocation69_spill] sm:$0xff] %v1936_v59  ;;  %v1940_v58 = vld [vmem:[#allocation2 + $0x2a8] sm:$0xff]  ;;  %399 = vmatpush2.msra.mxu1 %v1936_v59 }
  0x70   :  { %468 = vmatpush2.msra.mxu0 %v1926_v57  ;;  %2622 = vst [vmem:[#allocation71_spill] sm:$0xff] %v1940_v58  ;;  %v1946_v57 = vld [vmem:[#allocation2 + $0x2a0] sm:$0xff]  ;;  %400 = vmatprep.subr.mxu1 %v1940_v58 }
  0x71   :  { %469 = vmatprep.subr.mxu0 %v1932_v56  ;;  %2624 = vst [vmem:[#allocation73_spill] sm:$0xff] %v1946_v57  ;;  %v1952_v56 = vld [vmem:[#allocation2 + $0x288] sm:$0xff]  ;;  %401 = vmatpush2.msra.mxu1 %v1946_v57  ;;  %v1980_v57 = vld [vmem:[#allocation2 + $0x240] sm:$0xff] }
  0x72   :  { %470 = vmatpush2.msra.mxu0 %v1938_v55  ;;  %2626 = vst [vmem:[#allocation75_spill] sm:$0xff] %v1952_v56  ;;  %v1960_v55 = vld [vmem:[#allocation2 + $0x290] sm:$0xff]  ;;  %402 = vmatprep.subr.mxu1 %v1952_v56  ;;  %2636 = vst [vmem:[#allocation85_spill] sm:$0xff] %v1980_v57 }
  0x73   :  { %471 = vmatprep.subr.mxu0 %v1944_v54  ;;  %2629 = vst [vmem:[#allocation78_spill] sm:$0xff] %v1960_v55  ;;  %v1968_v54 = vld [vmem:[#allocation2 + $0x260] sm:$0xff]  ;;  %403 = vmatpush2.msra.mxu1 %v1956_v51  ;;  %v1982_v56 = vld [vmem:[#allocation2 + $0x250] sm:$0xff]  ;;  %v1988_v51 = vld [vmem:[#allocation2 + $0x238] sm:$0xff] }
  0x74   :  { %472 = vmatpush2.msra.mxu0 %v1948_v53  ;;  %2632 = vst [vmem:[#allocation81_spill] sm:$0xff] %v1968_v54  ;;  %v1976_v53 = vld [vmem:[#allocation2 + $0x258] sm:$0xff]  ;;  %404 = vmatprep.subr.mxu1 %v1962_v49  ;;  %2637 = vst [vmem:[#allocation86_spill] sm:$0xff] %v1982_v56  ;;  %v1994_v49 = vld [vmem:[#allocation2 + $0x230] sm:$0xff] }
  0x75   :  { %473 = vmatprep.subr.mxu0 %v1954_v52  ;;  %2635 = vst [vmem:[#allocation84_spill] sm:$0xff] %v1976_v53  ;;  %405 = vmatpush2.msra.mxu1 %v1968_v54  ;;  %v1986_v52 = vld [vmem:[#allocation2 + $0x228] sm:$0xff]  ;;  %2639 = vst [vmem:[#allocation88_spill] sm:$0xff] %v1988_v51  ;;  %v2000_v54 = vld [vmem:[#allocation2 + $0x218] sm:$0xff] }
  0x76   :  { %474 = vmatpush2.msra.mxu0 %v1960_v55  ;;  %2638 = vst [vmem:[#allocation87_spill] sm:$0xff] %v1986_v52  ;;  %406 = vmatprep.subr.mxu1 %v1974_v44  ;;  %v1992_v55 = vld [vmem:[#allocation2 + $0x220] sm:$0xff]  ;;  %2641 = vst [vmem:[#allocation90_spill] sm:$0xff] %v1994_v49 }
  0x77   :  { %475 = vmatprep.subr.mxu0 %v1964_v47  ;;  %2640 = vst [vmem:[#allocation89_spill] sm:$0xff] %v1992_v55  ;;  %407 = vmatpush2.msra.mxu1 %v1980_v57  ;;  %v1998_v47 = vld [vmem:[#allocation2 + $0x208] sm:$0xff]  ;;  %2643 = vst [vmem:[#allocation92_spill] sm:$0xff] %v2000_v54 }
  0x78   :  { %476 = vmatpush2.msra.mxu0 %v1970_v45  ;;  %2642 = vst [vmem:[#allocation91_spill] sm:$0xff] %v1998_v47  ;;  %408 = vmatprep.subr.mxu1 %v1986_v52  ;;  %v2004_v45 = vld [vmem:[#allocation2 + $0x200] sm:$0xff] }
  0x79   :  { %477 = vmatprep.subr.mxu0 %v1976_v53  ;;  %2644 = vst [vmem:[#allocation93_spill] sm:$0xff] %v2004_v45  ;;  %v2009_v53 = vld [vmem:[%s2433_s1] sm:$0xff]  ;;  %409 = vmatpush2.msra.mxu1 %v1992_v55 }
  0x7a   :  { %478 = vmatpush2.msra.mxu0 %v1982_v56  ;;  %v2013_v56 = vld [vmem:[#allocation2 + $0x210] sm:$0xff]  ;;  %410 = vmatprep.subr.mxu1 %v1998_v47 }
  0x7b   :  { %479 = vmatprep.subr.mxu0 %v1988_v51  ;;  %411 = vmatpush2.msra.mxu1 %v2004_v45  ;;  %v2645_v51 = vmov 0.0  }
  0x7c   :  { %480 = vmatpush2.msra.mxu0 %v1994_v49  ;;  %412 = vmatprep.mubr.f32.mxu1 %v2009_v53  ;;  %v1082_v49 = vld [vmem:[%s2435_s3] ss:$0 sm:$0xff] }
  0x7d   :  { %481 = vmatprep.subr.mxu0 %v2000_v54  ;;  %483 = vmatprep.mubr.f32.mxu0 %v2009_v53 }
  0x7e   :  { %482 = vmatpush2.msra.mxu0 %v2013_v56  ;;  %1194 = vmatprep.subr.mxu1 %v2645_v51 }
  0x7f   :  { %580 = vmatprep.subr.mxu0 %v1578_v5  ;;  %v2646_v5 = vld [vmem:[#allocation73_spill] sm:$0xff] }
  0xff   :  { %v316_v55 = vpop.f32.mrf.mxu0 }
 0x100   :  { %v317_v47 = vadd.f32 %v1082_v49, %v316_v55  ;;  %v2142_v49 = vld [vmem:[#allocation5 + $0x10] sm:$0xff] }
 0x101   :  { %v1193_v52 = vpop.f32.mrf.mxu0  ;;  %v2657_v55 = vld [vmem:[#allocation14_spill] sm:$0xff] }
 0x102   :  { %v1083_v54 = vmul.f32 -1.442695, %v317_v47  ;;  %v2138_v47 = vld [vmem:[#allocation5 + $0x18] sm:$0xff]  ;;  %v2146_v52 = vld [vmem:[#allocation5 + $0x8] sm:$0xff] }
 0x104   :  { %1309 = vpow2.f32 %v1083_v54  ;;  %v2150_v54 = vld [vmem:[#allocation5] sm:$0xff] }
 0x111   :  { %v1310_v45 = vpop.eup %1309 }
 0x112   :  { %v323_v57 = vadd.f32 1.0, %v1310_v45  ;;  %v2134_v45 = vld [vmem:[#allocation5 + $0x20] sm:$0xff] }
 0x114   :  { %1311 = vrcp.f32 %v323_v57  ;;  %v328_v57 = vlaneseq }
 0x121   :  { %v1312_v44 = vpop.eup %1311 }
 0x122   :  { %413 = vmatmul.mubr.f32.vlgmr.msra.gmra.mxu1 %v1312_v44  ;;  %484 = vmatmul.mubr.f32.vlgmr.msra.gmra.mxu0 %v1312_v44  ;;  %v2130_v44 = vld [vmem:[#allocation5 + $0x28] sm:$0xff] }
 0x123   :  { %1226 = vmatprep.mubr.msk.f32.mxu1 %vm1497_vm0, %v2645_v51  ;;  %581 = vmatpush1.msra.mxu0 %v1585_v7  ;;  %v2647_v7 = vld [vmem:[#allocation75_spill] sm:$0xff] }
 0x124   :  { %582 = vmatprep.subr.mxu0 %v1588_v8  ;;  %v2648_v8 = vld [vmem:[#allocation77_spill] sm:$0xff] }
 0x125   :  { %583 = vmatpush1.msra.mxu0 %v1590_v9  ;;  %v2649_v9 = vld [vmem:[#allocation79_spill] sm:$0xff] }
 0x126   :  { %584 = vmatprep.subr.mxu0 %v1597_v11  ;;  %v2650_v11 = vld [vmem:[#allocation81_spill] sm:$0xff] }
 0x127   :  { %585 = vmatpush1.msra.mxu0 %v1600_v12  ;;  %v2651_v12 = vld [vmem:[#allocation83_spill] sm:$0xff] }
 0x128   :  { %586 = vmatprep.subr.mxu0 %v1602_v13  ;;  %v2652_v13 = vld [vmem:[#allocation85_spill] sm:$0xff] }
 0x129   :  { %587 = vmatpush1.msra.mxu0 %v1609_v15  ;;  %v2653_v15 = vld [vmem:[#allocation87_spill] sm:$0xff] }
 0x12a   :  { %588 = vmatprep.subr.mxu0 %v1612_v16  ;;  %v2654_v16 = vld [vmem:[#allocation89_spill] sm:$0xff] }
 0x12b   :  { %589 = vmatpush1.msra.mxu0 %v1619_v18  ;;  %v2655_v18 = vld [vmem:[#allocation91_spill] sm:$0xff] }
 0x12c   :  { %590 = vmatprep.subr.mxu0 %v1622_v19  ;;  %v2656_v19 = vld [vmem:[#allocation93_spill] sm:$0xff] }
 0x12d   :  { %591 = vmatpush1.msra.mxu0 %v1629_v21  ;;  %v2092_v21 = vld [vmem:[#allocation5 + $0x78] sm:$0xff] }
 0x12e   :  { %592 = vmatprep.subr.mxu0 %v1632_v22  ;;  %1195 = vmatpush3.msra.mxu1 %v2092_v21  ;;  %v2096_v22 = vld [vmem:[#allocation5 + $0x70] sm:$0xff] }
 0x12f   :  { %593 = vmatpush1.msra.mxu0 %v1639_v24  ;;  %1196 = vmatprep.subr.mxu1 %v2645_v51  ;;  %v2100_v24 = vld [vmem:[#allocation5 + $0x68] sm:$0xff] }
 0x130   :  { %594 = vmatprep.subr.mxu0 %v1642_v25  ;;  %1197 = vmatpush3.msra.mxu1 %v2096_v22  ;;  %v2104_v25 = vld [vmem:[#allocation5 + $0x60] sm:$0xff] }
 0x131   :  { %595 = vmatpush1.msra.mxu0 %v1649_v27  ;;  %1198 = vmatprep.subr.mxu1 %v2645_v51  ;;  %v2108_v27 = vld [vmem:[#allocation5 + $0x58] sm:$0xff] }
 0x132   :  { %596 = vmatprep.subr.mxu0 %v1652_v28  ;;  %1199 = vmatpush3.msra.mxu1 %v2100_v24  ;;  %v2112_v28 = vld [vmem:[#allocation5 + $0x50] sm:$0xff] }
 0x133   :  { %597 = vmatpush1.msra.mxu0 %v1659_v30  ;;  %1200 = vmatprep.subr.mxu1 %v2645_v51  ;;  %v2116_v30 = vld [vmem:[#allocation5 + $0x48] sm:$0xff] }
 0x134   :  { %598 = vmatprep.subr.mxu0 %v1662_v31  ;;  %1201 = vmatpush3.msra.mxu1 %v2104_v25  ;;  %v2120_v31 = vld [vmem:[#allocation5 + $0x40] sm:$0xff] }
 0x135   :  { %599 = vmatpush1.msra.mxu0 %v1669_v33  ;;  %1202 = vmatprep.subr.mxu1 %v2645_v51  ;;  %v2122_v33 = vld [vmem:[#allocation5 + $0x38] sm:$0xff] }
 0x136   :  { %600 = vmatprep.subr.mxu0 %v1672_v34  ;;  %1203 = vmatpush3.msra.mxu1 %v2108_v27  ;;  %v2126_v34 = vld [vmem:[#allocation5 + $0x30] sm:$0xff] }
 0x137   :  { %601 = vmatpush1.msra.mxu0 %v1679_v36  ;;  %1204 = vmatprep.subr.mxu1 %v2645_v51 }
 0x138   :  { %602 = vmatprep.subr.mxu0 %v1682_v37  ;;  %1205 = vmatpush3.msra.mxu1 %v2112_v28 }
 0x139   :  { %603 = vmatpush1.msra.mxu0 %v1689_v39  ;;  %1206 = vmatprep.subr.mxu1 %v2645_v51 }
 0x13a   :  { %604 = vmatprep.subr.mxu0 %v1692_v40  ;;  %1207 = vmatpush3.msra.mxu1 %v2116_v30 }
 0x13b   :  { %605 = vmatpush1.msra.mxu0 %v1699_v42  ;;  %1208 = vmatprep.subr.mxu1 %v2645_v51 }
 0x13c   :  { %606 = vmatprep.subr.mxu0 %v1711_v46  ;;  %1209 = vmatpush3.msra.mxu1 %v2120_v31 }
 0x13d   :  { %607 = vmatpush1.msra.mxu0 %v1716_v48  ;;  %1210 = vmatprep.subr.mxu1 %v2645_v51 }
 0x13e   :  { %608 = vmatprep.subr.mxu0 %v1721_v50  ;;  %1211 = vmatpush3.msra.mxu1 %v2122_v33 }
 0x13f   :  { %609 = vmatpush1.msra.mxu0 %v1804_v32  ;;  %1212 = vmatprep.subr.mxu1 %v2645_v51 }
 0x140   :  { %610 = vmatprep.subr.mxu0 %v1810_v38  ;;  %1213 = vmatpush3.msra.mxu1 %v2126_v34 }
 0x141   :  { %611 = vmatpush1.msra.mxu0 %v1816_v43  ;;  %1214 = vmatprep.subr.mxu1 %v2645_v51 }
 0x142   :  { %612 = vmatprep.subr.mxu0 %v1822_v29  ;;  %1215 = vmatpush3.msra.mxu1 %v2130_v44 }
 0x143   :  { %613 = vmatpush2.msra.mxu0 %v1828_v35  ;;  %1216 = vmatprep.subr.mxu1 %v2645_v51 }
 0x144   :  { %614 = vmatprep.subr.mxu0 %v1834_v41  ;;  %1217 = vmatpush3.msra.mxu1 %v2134_v45 }
 0x145   :  { %615 = vmatpush2.msra.mxu0 %v1840_v0  ;;  %1218 = vmatprep.subr.mxu1 %v2645_v51 }
 0x146   :  { %616 = vmatprep.subr.mxu0 %v1846_v26  ;;  %1219 = vmatpush3.msra.mxu1 %v2138_v47 }
 0x147   :  { %617 = vmatpush2.msra.mxu0 %v1852_v23  ;;  %1220 = vmatprep.subr.mxu1 %v2645_v51 }
 0x148   :  { %618 = vmatprep.subr.mxu0 %v1858_v20  ;;  %1221 = vmatpush3.msra.mxu1 %v2142_v49 }
 0x149   :  { %619 = vmatpush2.msra.mxu0 %v1864_v17  ;;  %1222 = vmatprep.subr.mxu1 %v2645_v51 }
 0x14a   :  { %620 = vmatprep.subr.mxu0 %v1870_v14  ;;  %1223 = vmatpush3.msra.mxu1 %v2146_v52 }
 0x14b   :  { %621 = vmatpush2.msra.mxu0 %v1876_v10  ;;  %1224 = vmatprep.subr.mxu1 %v2645_v51 }
 0x14c   :  { %622 = vmatprep.subr.mxu0 %v1882_v6  ;;  %1225 = vmatpush3.msra.mxu1 %v2150_v54 }
 0x14d   :  { %623 = vmatpush2.msra.mxu0 %v1888_v4  ;;  %651 = vmatprep.subr.mxu1 %v2657_v55 }
 0x14e   :  { %624 = vmatprep.subr.mxu0 %v1894_v3 }
 0x14f   :  { %625 = vmatpush2.msra.mxu0 %v1900_v2 }
 0x150   :  { %626 = vmatprep.subr.mxu0 %v1906_v1 }
 0x151   :  { %627 = vmatpush2.msra.mxu0 %v1912_v63 }
 0x152   :  { %628 = vmatprep.subr.mxu0 %v1918_v62 }
 0x153   :  { %629 = vmatpush2.msra.mxu0 %v1924_v61 }
 0x154   :  { %630 = vmatprep.subr.mxu0 %v1930_v60 }
 0x155   :  { %631 = vmatpush2.msra.mxu0 %v1936_v59 }
 0x156   :  { %632 = vmatprep.subr.mxu0 %v1940_v58 }
 0x157   :  { %633 = vmatpush2.msra.mxu0 %v2646_v5 }
 0x158   :  { %634 = vmatprep.subr.mxu0 %v2647_v7 }
 0x159   :  { %635 = vmatpush2.msra.mxu0 %v2648_v8 }
 0x15a   :  { %636 = vmatprep.subr.mxu0 %v2649_v9 }
 0x15b   :  { %637 = vmatpush2.msra.mxu0 %v2650_v11 }
 0x15c   :  { %638 = vmatprep.subr.mxu0 %v2651_v12 }
 0x15d   :  { %639 = vmatpush2.msra.mxu0 %v2652_v13 }
 0x15e   :  { %640 = vmatprep.subr.mxu0 %v2653_v15 }
 0x15f   :  { %641 = vmatpush2.msra.mxu0 %v2654_v16  ;;  %v241_v16 = vld [vmem:[%s2437_s5] sm:$0xf] }
 0x160   :  { %642 = vmatprep.subr.mxu0 %v2655_v18 }
 0x161   :  { %643 = vmatpush2.msra.mxu0 %v2656_v19  ;;  %v329_v19 = vshrl.u32 %v328_v57, 7 }
 0x162   :  { %1229 = vmatprep.subr.mxu0 %v2645_v51 }
 0x163   :  { %v330_v18 = vsub.s32 0, %v329_v19  ;;  %v334_v13 = vsub.s32 1, %v329_v19  ;;  %v342_v59 = vsub.s32 3, %v329_v19 }
 0x165   :  { %v2159_v15 = vrot.slane %v241_v16, %v330_v18  ;;  %v2162_v8 = vrot.slane %v241_v16, %v334_v13  ;;  %v338_v18 = vsub.s32 2, %v329_v19  ;;  %v2165_v62 = vrot.slane %v241_v16, %v342_v59 }
 0x167   :  { %2658 = vst [vmem:[#allocation14_spill] sm:$0xff] %v2159_v15  ;;  %2659 = vst [vmem:[#allocation94_spill] sm:$0xff] %v2162_v8 }
 0x1e2   :  { %v414_v12 = vpop.f32.mrf.mxu1  ;;  %v485_v60 = vpop.f32.mrf.mxu0 }
 0x1e3   :  { %v415_v11 = vadd.f32 %v414_v12, %v2159_v15  ;;  %v2167_v12 = vrot.slane %v241_v16, %v338_v18  ;;  %v2663_v16 = vld [vmem:[#allocation18_spill] sm:$0xff]  ;;  %v2664_v18 = vld [vmem:[#allocation19_spill] sm:$0xff] }
 0x1e4   :  { %v416_v7 = vpop.f32.mrf.mxu1  ;;  %v487_v63 = vpop.f32.mrf.mxu0 }
 0x1e5   :  { %v1084_v9 = vmul.f32 -1.442695, %v415_v11  ;;  %v417_v55 = vadd.f32 %v416_v7, %v2162_v8  ;;  %v488_v13 = vadd.f32 %v487_v63, %v2165_v62  ;;  %v486_v7 = vadd.f32 %v485_v60, %v2167_v12  ;;  %v2661_v60 = vld [vmem:[#allocation16_spill] sm:$0xff]  ;;  %v2662_v63 = vld [vmem:[#allocation17_spill] sm:$0xff] }
 0x1e7   :  { %1313 = vpow2.f32 %v1084_v9  ;;  %v1085_v5 = vmul.f32 -1.442695, %v417_v55 }
 0x1e9   :  { %1315 = vpow2.f32 %v1085_v5 }
 0x1f4   :  { %v1314_v57 = vpop.eup %1313 }
 0x1f5   :  { %v493_v58 = vadd.f32 1.0, %v1314_v57 }
 0x1f6   :  { %v1316_v61 = vpop.eup %1315 }
 0x1f7   :  { %1317 = vrcp.f32 %v493_v58  ;;  %v499_v11 = vadd.f32 1.0, %v1316_v61  ;;  %v2660_v61 = vld [vmem:[#allocation15_spill] sm:$0xff] }
 0x1f9   :  { %1319 = vrcp.f32 %v499_v11  ;;  %v2667_v11 = vld [vmem:[#allocation22_spill] sm:$0xff] }
 0x204   :  { %v1318_v9 = vpop.eup %1317 }
 0x205   :  { %v502_v5 = vmul.f32 %v1318_v9, %v488_v13  ;;  %v2668_v13 = vld [vmem:[#allocation23_spill] sm:$0xff]  ;;  %v2669_v9 = vld [vmem:[#allocation24_spill] sm:$0xff] }
 0x206   :  { %v1320_v58 = vpop.eup %1319 }
 0x207   :  { %v503_v55 = vadd.f32 %v502_v5, %v486_v7  ;;  %v505_v57 = vsub.f32 1.0, %v1320_v58  ;;  %v507_v59 = vmul.f32 %v1320_v58, %v2009_v53  ;;  %v2666_v53 = vld [vmem:[#allocation21_spill] sm:$0xff]  ;;  %v2671_v5 = vld [vmem:[#allocation26_spill] sm:$0xff]  ;;  %v2673_v58 = vld [vmem:[#allocation28_spill] sm:$0xff] }
 0x208   :  { %v2670_v7 = vld [vmem:[#allocation25_spill] sm:$0xff] }
 0x209   :  { %1321 = vtanh.f32 %v503_v55  ;;  %v2672_v55 = vld [vmem:[#allocation27_spill] sm:$0xff] }
 0x216   :  { %v1322_v8 = vpop.eup %1321 }
 0x217   :  { %v506_v19 = vmul.f32 %v1322_v8, %v505_v57  ;;  %v2665_v8 = vld [vmem:[#allocation20_spill] sm:$0xff]  ;;  %v2674_v57 = vld [vmem:[#allocation29_spill] sm:$0xff] }
 0x219   :  { %v2172_v15 = vadd.f32 %v507_v59, %v506_v19  ;;  %v2675_v19 = vld [vmem:[#allocation30_spill] sm:$0xff]  ;;  %v2676_v59 = vld [vmem:[#allocation31_spill] sm:$0xff] }
 0x21b   :  { %1227 = vmatmul.mubr.f32.vlgmr.msra.gmra.mxu1 %v2172_v15  ;;  %644 = vmatprep.mubr.f32.mxu0 %v2172_v15 }
 0x21c   :  { %715 = vmatprep.mubr.f32.mxu1 %v2172_v15  ;;  %652 = vmatpush1.msra.mxu1 %v2660_v61  ;;  %v2677_v61 = vld [vmem:[#allocation32_spill] sm:$0xff] }
 0x21d   :  { %653 = vmatprep.subr.mxu1 %v2661_v60  ;;  %v2678_v60 = vld [vmem:[#allocation33_spill] sm:$0xff] }
 0x21e   :  { %654 = vmatpush1.msra.mxu1 %v2662_v63  ;;  %v2679_v63 = vld [vmem:[#allocation34_spill] sm:$0xff] }
 0x21f   :  { %655 = vmatprep.subr.mxu1 %v2663_v16  ;;  %v2680_v16 = vld [vmem:[#allocation35_spill] sm:$0xff] }
 0x220   :  { %656 = vmatpush1.msra.mxu1 %v2664_v18  ;;  %v2681_v18 = vld [vmem:[#allocation36_spill] sm:$0xff] }
 0x221   :  { %657 = vmatprep.subr.mxu1 %v2665_v8  ;;  %v2682_v8 = vld [vmem:[#allocation37_spill] sm:$0xff] }
 0x222   :  { %658 = vmatpush1.msra.mxu1 %v2666_v53  ;;  %v2683_v53 = vld [vmem:[#allocation38_spill] sm:$0xff] }
 0x223   :  { %659 = vmatprep.subr.mxu1 %v2667_v11  ;;  %v2684_v11 = vld [vmem:[#allocation39_spill] sm:$0xff] }
 0x224   :  { %660 = vmatpush1.msra.mxu1 %v2668_v13  ;;  %v2685_v13 = vld [vmem:[#allocation40_spill] sm:$0xff] }
 0x225   :  { %661 = vmatprep.subr.mxu1 %v2669_v9  ;;  %v2686_v9 = vld [vmem:[#allocation41_spill] sm:$0xff] }
 0x226   :  { %662 = vmatpush1.msra.mxu1 %v2670_v7  ;;  %v2687_v7 = vld [vmem:[#allocation42_spill] sm:$0xff] }
 0x227   :  { %663 = vmatprep.subr.mxu1 %v2671_v5  ;;  %v2688_v5 = vld [vmem:[#allocation43_spill] sm:$0xff] }
 0x228   :  { %664 = vmatpush1.msra.mxu1 %v2672_v55  ;;  %v2689_v55 = vld [vmem:[#allocation44_spill] sm:$0xff] }
 0x229   :  { %665 = vmatprep.subr.mxu1 %v2673_v58  ;;  %v2690_v58 = vld [vmem:[#allocation45_spill] sm:$0xff] }
 0x22a   :  { %666 = vmatpush1.msra.mxu1 %v2674_v57  ;;  %v2691_v57 = vld [vmem:[#allocation46_spill] sm:$0xff] }
 0x22b   :  { %667 = vmatprep.subr.mxu1 %v2675_v19  ;;  %v2692_v19 = vld [vmem:[#allocation47_spill] sm:$0xff] }
 0x22c   :  { %668 = vmatpush1.msra.mxu1 %v2676_v59  ;;  %v2693_v59 = vld [vmem:[#allocation48_spill] sm:$0xff] }
 0x22d   :  { %669 = vmatprep.subr.mxu1 %v2677_v61  ;;  %v2694_v61 = vld [vmem:[#allocation49_spill] sm:$0xff] }
 0x22e   :  { %670 = vmatpush1.msra.mxu1 %v2678_v60  ;;  %v2695_v60 = vld [vmem:[#allocation50_spill] sm:$0xff] }
 0x22f   :  { %671 = vmatprep.subr.mxu1 %v2679_v63  ;;  %v2696_v63 = vld [vmem:[#allocation51_spill] sm:$0xff] }
 0x230   :  { %672 = vmatpush1.msra.mxu1 %v2680_v16  ;;  %v2697_v16 = vld [vmem:[#allocation52_spill] sm:$0xff] }
 0x231   :  { %673 = vmatprep.subr.mxu1 %v2681_v18  ;;  %v2698_v18 = vld [vmem:[#allocation53_spill] sm:$0xff] }
 0x232   :  { %674 = vmatpush1.msra.mxu1 %v2682_v8  ;;  %v2699_v8 = vld [vmem:[#allocation54_spill] sm:$0xff] }
 0x233   :  { %675 = vmatprep.subr.mxu1 %v2683_v53  ;;  %v2700_v53 = vld [vmem:[#allocation55_spill] sm:$0xff] }
 0x234   :  { %676 = vmatpush1.msra.mxu1 %v2684_v11  ;;  %v2701_v11 = vld [vmem:[#allocation56_spill] sm:$0xff] }
 0x235   :  { %677 = vmatprep.subr.mxu1 %v2685_v13  ;;  %v2702_v13 = vld [vmem:[#allocation57_spill] sm:$0xff] }
 0x236   :  { %678 = vmatpush1.msra.mxu1 %v2686_v9  ;;  %v2703_v9 = vld [vmem:[#allocation58_spill] sm:$0xff] }
 0x237   :  { %679 = vmatprep.subr.mxu1 %v2687_v7  ;;  %v2704_v7 = vld [vmem:[#allocation59_spill] sm:$0xff] }
 0x238   :  { %680 = vmatpush1.msra.mxu1 %v2688_v5  ;;  %v2705_v5 = vld [vmem:[#allocation60_spill] sm:$0xff] }
 0x239   :  { %681 = vmatprep.subr.mxu1 %v2689_v55  ;;  %v2706_v55 = vld [vmem:[#allocation62_spill] sm:$0xff] }
 0x23a   :  { %682 = vmatpush1.msra.mxu1 %v2690_v58  ;;  %v2707_v58 = vld [vmem:[#allocation64_spill] sm:$0xff] }
 0x23b   :  { %683 = vmatprep.subr.mxu1 %v2691_v57  ;;  %v2708_v57 = vld [vmem:[#allocation66_spill] sm:$0xff] }
 0x23c   :  { %684 = vmatpush2.msra.mxu1 %v2692_v19  ;;  %v2709_v19 = vld [vmem:[#allocation68_spill] sm:$0xff] }
 0x23d   :  { %685 = vmatprep.subr.mxu1 %v2693_v59  ;;  %v2710_v59 = vld [vmem:[#allocation70_spill] sm:$0xff] }
 0x23e   :  { %686 = vmatpush2.msra.mxu1 %v2694_v61  ;;  %v2711_v61 = vld [vmem:[#allocation72_spill] sm:$0xff] }
 0x23f   :  { %687 = vmatprep.subr.mxu1 %v2695_v60  ;;  %v2712_v60 = vld [vmem:[#allocation74_spill] sm:$0xff] }
 0x240   :  { %688 = vmatpush2.msra.mxu1 %v2696_v63  ;;  %v2713_v63 = vld [vmem:[#allocation76_spill] sm:$0xff] }
 0x241   :  { %689 = vmatprep.subr.mxu1 %v2697_v16 }
 0x242   :  { %690 = vmatpush2.msra.mxu1 %v2698_v18 }
 0x243   :  { %691 = vmatprep.subr.mxu1 %v2699_v8 }
 0x244   :  { %692 = vmatpush2.msra.mxu1 %v2700_v53 }
 0x245   :  { %693 = vmatprep.subr.mxu1 %v2701_v11 }
 0x246   :  { %694 = vmatpush2.msra.mxu1 %v2702_v13 }
 0x247   :  { %695 = vmatprep.subr.mxu1 %v2703_v9  ;;  %v2714_v9 = vld [vmem:[#allocation78_spill] sm:$0xff] }
 0x248   :  { %696 = vmatpush2.msra.mxu1 %v2704_v7  ;;  %v2715_v7 = vld [vmem:[#allocation80_spill] sm:$0xff] }
 0x249   :  { %697 = vmatprep.subr.mxu1 %v2705_v5  ;;  %v2716_v5 = vld [vmem:[#allocation82_spill] sm:$0xff] }
 0x24a   :  { %698 = vmatpush2.msra.mxu1 %v2706_v55  ;;  %v2717_v55 = vld [vmem:[#allocation84_spill] sm:$0xff] }
 0x24b   :  { %699 = vmatprep.subr.mxu1 %v2707_v58  ;;  %v2718_v58 = vld [vmem:[#allocation86_spill] sm:$0xff] }
 0x24c   :  { %700 = vmatpush2.msra.mxu1 %v2708_v57  ;;  %v2719_v57 = vld [vmem:[#allocation88_spill] sm:$0xff] }
 0x24d   :  { %701 = vmatprep.subr.mxu1 %v2709_v19  ;;  %v2720_v19 = vld [vmem:[#allocation90_spill] sm:$0xff] }
 0x24e   :  { %702 = vmatpush2.msra.mxu1 %v2710_v59  ;;  %v2721_v59 = vld [vmem:[#allocation92_spill] sm:$0xff] }
 0x24f   :  { %703 = vmatprep.subr.mxu1 %v2711_v61 }
 0x250   :  { %704 = vmatpush2.msra.mxu1 %v2712_v60  ;;  %v1343_v60 = vld [vmem:[#allocation2 + $0x1e8] sm:$0xff] }
 0x251   :  { %705 = vmatprep.subr.mxu1 %v2713_v63 }
 0x252   :  { %706 = vmatpush2.msra.mxu1 %v2714_v9 }
 0x253   :  { %707 = vmatprep.subr.mxu1 %v2715_v7 }
 0x254   :  { %708 = vmatpush2.msra.mxu1 %v2716_v5 }
 0x255   :  { %709 = vmatprep.subr.mxu1 %v2717_v55 }
 0x256   :  { %710 = vmatpush2.msra.mxu1 %v2718_v58 }
 0x257   :  { %711 = vmatprep.subr.mxu1 %v2719_v57  ;;  %v1344_v57 = vld [vmem:[#allocation2 + $0x1e0] sm:$0xff] }
 0x258   :  { %712 = vmatpush2.msra.mxu1 %v2720_v19 }
 0x259   :  { %713 = vmatprep.subr.mxu1 %v2721_v59  ;;  %v1345_v59 = vld [vmem:[#allocation2 + $0x1c8] sm:$0xff] }
 0x25a   :  { %714 = vmatpush2.msra.mxu1 %v2013_v56 }
 0x25b   :  { %812 = vmatprep.subr.mxu1 %v1343_v60  ;;  %v1346_v60 = vld [vmem:[#allocation2 + $0x1c0] sm:$0xff] }
 0x2db   :  { %v575_v63 = vpop.f32.mrf.mxu1 }
 0x2dc   :  { %v579_v9 = vmul.f32 0.25, %v575_v63  ;;  %v1355_v63 = vld [vmem:[#allocation2 + $0x128] sm:$0xff] }
 0x2dd   :  { %v1228_v61 = vpop.f32.mrf.mxu1 }
 0x2de   :  { %645 = vmatmul.mubr.f32.vlgmr.msra.gmra.mxu0 %v579_v9  ;;  %716 = vmatmul.mubr.f32.vlgmr.msra.gmra.mxu1 %v579_v9  ;;  %v1347_v9 = vld [vmem:[#allocation2 + $0x1a8] sm:$0xff] }
 0x2df   :  { %1230 = vmatpush3.msra.mxu0 %v2092_v21  ;;  %1261 = vmatprep.mubr.msk.f32.mxu0 %vm1497_vm0, %v2645_v51  ;;  %v1348_v21 = vld [vmem:[#allocation2 + $0x1a0] sm:$0xff]  ;;  %v1349_v61 = vld [vmem:[#allocation2 + $0x188] sm:$0xff] }
 0x2e0   :  { %1231 = vmatprep.subr.mxu0 %v2645_v51  ;;  %813 = vmatpush1.msra.mxu1 %v1344_v57  ;;  %v1351_v57 = vld [vmem:[#allocation2 + $0x168] sm:$0xff] }
 0x2e1   :  { %1232 = vmatpush3.msra.mxu0 %v2096_v22  ;;  %814 = vmatprep.subr.mxu1 %v1345_v59  ;;  %v1350_v22 = vld [vmem:[#allocation2 + $0x180] sm:$0xff]  ;;  %v1353_v59 = vld [vmem:[#allocation2 + $0x148] sm:$0xff] }
 0x2e2   :  { %1233 = vmatprep.subr.mxu0 %v2645_v51  ;;  %815 = vmatpush1.msra.mxu1 %v1346_v60  ;;  %v1357_v60 = vld [vmem:[#allocation2 + $0x108] sm:$0xff] }
 0x2e3   :  { %1234 = vmatpush3.msra.mxu0 %v2100_v24  ;;  %816 = vmatprep.subr.mxu1 %v1347_v9  ;;  %v1352_v24 = vld [vmem:[#allocation2 + $0x160] sm:$0xff]  ;;  %v1359_v9 = vld [vmem:[#allocation2 + $0xe8] sm:$0xff] }
 0x2e4   :  { %1235 = vmatprep.subr.mxu0 %v2645_v51  ;;  %817 = vmatpush1.msra.mxu1 %v1348_v21  ;;  %v1361_v21 = vld [vmem:[#allocation2 + $0xc8] sm:$0xff] }
 0x2e5   :  { %1236 = vmatpush3.msra.mxu0 %v2104_v25  ;;  %818 = vmatprep.subr.mxu1 %v1349_v61  ;;  %v1354_v25 = vld [vmem:[#allocation2 + $0x140] sm:$0xff]  ;;  %v1363_v61 = vld [vmem:[#allocation2 + $0xa8] sm:$0xff] }
 0x2e6   :  { %1237 = vmatprep.subr.mxu0 %v2645_v51  ;;  %819 = vmatpush1.msra.mxu1 %v1350_v22 }
 0x2e7   :  { %1238 = vmatpush3.msra.mxu0 %v2108_v27  ;;  %820 = vmatprep.subr.mxu1 %v1351_v57  ;;  %v1356_v27 = vld [vmem:[#allocation2 + $0x120] sm:$0xff] }
 0x2e8   :  { %1239 = vmatprep.subr.mxu0 %v2645_v51  ;;  %821 = vmatpush1.msra.mxu1 %v1352_v24 }
 0x2e9   :  { %1240 = vmatpush3.msra.mxu0 %v2112_v28  ;;  %822 = vmatprep.subr.mxu1 %v1353_v59  ;;  %v1358_v28 = vld [vmem:[#allocation2 + $0x100] sm:$0xff] }
 0x2ea   :  { %1241 = vmatprep.subr.mxu0 %v2645_v51  ;;  %823 = vmatpush1.msra.mxu1 %v1354_v25 }
 0x2eb   :  { %1242 = vmatpush3.msra.mxu0 %v2116_v30  ;;  %824 = vmatprep.subr.mxu1 %v1355_v63  ;;  %v1360_v30 = vld [vmem:[#allocation2 + $0xe0] sm:$0xff] }
 0x2ec   :  { %1243 = vmatprep.subr.mxu0 %v2645_v51  ;;  %825 = vmatpush1.msra.mxu1 %v1356_v27 }
 0x2ed   :  { %1244 = vmatpush3.msra.mxu0 %v2120_v31  ;;  %826 = vmatprep.subr.mxu1 %v1357_v60  ;;  %v1362_v31 = vld [vmem:[#allocation2 + $0xc0] sm:$0xff] }
 0x2ee   :  { %1245 = vmatprep.subr.mxu0 %v2645_v51  ;;  %827 = vmatpush1.msra.mxu1 %v1358_v28 }
 0x2ef   :  { %1246 = vmatpush3.msra.mxu0 %v2122_v33  ;;  %828 = vmatprep.subr.mxu1 %v1359_v9  ;;  %v1365_v9 = vld [vmem:[#allocation2 + $0x1f0] sm:$0xff] }
 0x2f0   :  { %1247 = vmatprep.subr.mxu0 %v2645_v51  ;;  %829 = vmatpush1.msra.mxu1 %v1360_v30  ;;  %v1366_v30 = vld [vmem:[#allocation2 + $0x1d8] sm:$0xff] }
 0x2f1   :  { %1248 = vmatpush3.msra.mxu0 %v2126_v34  ;;  %830 = vmatprep.subr.mxu1 %v1361_v21  ;;  %v1367_v21 = vld [vmem:[#allocation2 + $0x1d0] sm:$0xff] }
 0x2f2   :  { %1249 = vmatprep.subr.mxu0 %v2645_v51  ;;  %831 = vmatpush1.msra.mxu1 %v1362_v31  ;;  %v1368_v31 = vld [vmem:[#allocation2 + $0x1b8] sm:$0xff] }
 0x2f3   :  { %1250 = vmatpush3.msra.mxu0 %v2130_v44  ;;  %832 = vmatprep.subr.mxu1 %v1363_v61  ;;  %v1369_v61 = vld [vmem:[#allocation2 + $0x1b0] sm:$0xff] }
 0x2f4   :  { %1251 = vmatprep.subr.mxu0 %v2645_v51  ;;  %833 = vmatpush1.msra.mxu1 %v1679_v36  ;;  %v1364_v36 = vld [vmem:[#allocation2 + $0x1f8] sm:$0xff] }
 0x2f5   :  { %1252 = vmatpush3.msra.mxu0 %v2134_v45  ;;  %834 = vmatprep.subr.mxu1 %v1682_v37  ;;  %v2723_v37 = vld [vmem:[#allocation63_spill] sm:$0xff] }
 0x2f6   :  { %1253 = vmatprep.subr.mxu0 %v2645_v51  ;;  %835 = vmatpush1.msra.mxu1 %v1689_v39  ;;  %v2724_v39 = vld [vmem:[#allocation65_spill] sm:$0xff] }
 0x2f7   :  { %1254 = vmatpush3.msra.mxu0 %v2138_v47  ;;  %836 = vmatprep.subr.mxu1 %v1692_v40  ;;  %v2725_v40 = vld [vmem:[#allocation67_spill] sm:$0xff] }
 0x2f8   :  { %1255 = vmatprep.subr.mxu0 %v2645_v51  ;;  %837 = vmatpush1.msra.mxu1 %v1699_v42  ;;  %v2726_v42 = vld [vmem:[#allocation69_spill] sm:$0xff] }
 0x2f9   :  { %1256 = vmatpush3.msra.mxu0 %v2142_v49  ;;  %838 = vmatprep.subr.mxu1 %v1711_v46  ;;  %v2727_v46 = vld [vmem:[#allocation71_spill] sm:$0xff] }
 0x2fa   :  { %1257 = vmatprep.subr.mxu0 %v2645_v51  ;;  %839 = vmatpush1.msra.mxu1 %v1716_v48  ;;  %v2728_v48 = vld [vmem:[#allocation73_spill] sm:$0xff] }
 0x2fb   :  { %1258 = vmatpush3.msra.mxu0 %v2146_v52  ;;  %840 = vmatprep.subr.mxu1 %v1721_v50  ;;  %v2729_v50 = vld [vmem:[#allocation75_spill] sm:$0xff] }
 0x2fc   :  { %1259 = vmatprep.subr.mxu0 %v2645_v51  ;;  %841 = vmatpush1.msra.mxu1 %v1804_v32 }
 0x2fd   :  { %1260 = vmatpush3.msra.mxu0 %v2150_v54  ;;  %842 = vmatprep.subr.mxu1 %v1810_v38  ;;  %v2740_v38 = vld [vmem:[#allocation94_spill] sm:$0xff] }
 0x2fe   :  { %883 = vmatprep.subr.mxu0 %v1364_v36  ;;  %843 = vmatpush1.msra.mxu1 %v1816_v43  ;;  %v1370_v36 = vld [vmem:[#allocation2 + $0x198] sm:$0xff] }
 0x2ff   :  { %844 = vmatprep.subr.mxu1 %v1822_v29 }
 0x300   :  { %845 = vmatpush2.msra.mxu1 %v1828_v35 }
 0x301   :  { %846 = vmatprep.subr.mxu1 %v1834_v41 }
 0x302   :  { %847 = vmatpush2.msra.mxu1 %v1840_v0  ;;  %v2722_v0 = vld [vmem:[#allocation61_spill] sm:$0xff] }
 0x303   :  { %848 = vmatprep.subr.mxu1 %v1846_v26  ;;  %v2739_v26 = vld [vmem:[#allocation14_spill] sm:$0xff] }
 0x304   :  { %849 = vmatpush2.msra.mxu1 %v1852_v23 }
 0x305   :  { %850 = vmatprep.subr.mxu1 %v1858_v20  ;;  %v2738_v20 = vld [vmem:[#allocation93_spill] sm:$0xff] }
 0x306   :  { %851 = vmatpush2.msra.mxu1 %v1864_v17  ;;  %v2737_v17 = vld [vmem:[#allocation91_spill] sm:$0xff] }
 0x307   :  { %852 = vmatprep.subr.mxu1 %v1870_v14  ;;  %v2736_v14 = vld [vmem:[#allocation89_spill] sm:$0xff] }
 0x308   :  { %853 = vmatpush2.msra.mxu1 %v1876_v10  ;;  %v2735_v10 = vld [vmem:[#allocation87_spill] sm:$0xff] }
 0x309   :  { %854 = vmatprep.subr.mxu1 %v1882_v6  ;;  %v2734_v6 = vld [vmem:[#allocation85_spill] sm:$0xff] }
 0x30a   :  { %855 = vmatpush2.msra.mxu1 %v1888_v4  ;;  %v2733_v4 = vld [vmem:[#allocation83_spill] sm:$0xff] }
 0x30b   :  { %856 = vmatprep.subr.mxu1 %v1894_v3  ;;  %v2730_v3 = vld [vmem:[#allocation77_spill] sm:$0xff] }
 0x30c   :  { %857 = vmatpush2.msra.mxu1 %v1900_v2  ;;  %v2731_v2 = vld [vmem:[#allocation79_spill] sm:$0xff] }
 0x30d   :  { %858 = vmatprep.subr.mxu1 %v1906_v1  ;;  %v2732_v1 = vld [vmem:[#allocation81_spill] sm:$0xff] }
 0x30e   :  { %859 = vmatpush2.msra.mxu1 %v2722_v0  ;;  %v1372_v0 = vld [vmem:[#allocation2 + $0x178] sm:$0xff] }
 0x30f   :  { %860 = vmatprep.subr.mxu1 %v2723_v37  ;;  %v1373_v37 = vld [vmem:[#allocation2 + $0x170] sm:$0xff] }
 0x310   :  { %861 = vmatpush2.msra.mxu1 %v2724_v39  ;;  %v1374_v39 = vld [vmem:[#allocation2 + $0x158] sm:$0xff] }
 0x311   :  { %862 = vmatprep.subr.mxu1 %v2725_v40  ;;  %v1375_v40 = vld [vmem:[#allocation2 + $0x150] sm:$0xff] }
 0x312   :  { %863 = vmatpush2.msra.mxu1 %v2726_v42  ;;  %v1376_v42 = vld [vmem:[#allocation2 + $0x138] sm:$0xff] }
 0x313   :  { %864 = vmatprep.subr.mxu1 %v2727_v46  ;;  %v1377_v46 = vld [vmem:[#allocation2 + $0x130] sm:$0xff] }
 0x314   :  { %865 = vmatpush2.msra.mxu1 %v2728_v48  ;;  %v1378_v48 = vld [vmem:[#allocation2 + $0x118] sm:$0xff] }
 0x315   :  { %866 = vmatprep.subr.mxu1 %v2729_v50  ;;  %v1379_v50 = vld [vmem:[#allocation2 + $0x110] sm:$0xff] }
 0x316   :  { %867 = vmatpush2.msra.mxu1 %v2730_v3  ;;  %v1380_v3 = vld [vmem:[#allocation2 + $0xf8] sm:$0xff] }
 0x317   :  { %868 = vmatprep.subr.mxu1 %v2731_v2  ;;  %v1381_v2 = vld [vmem:[#allocation2 + $0xf0] sm:$0xff] }
 0x318   :  { %869 = vmatpush2.msra.mxu1 %v2732_v1  ;;  %v1382_v1 = vld [vmem:[#allocation2 + $0xd8] sm:$0xff] }
 0x319   :  { %870 = vmatprep.subr.mxu1 %v2733_v4  ;;  %v1383_v4 = vld [vmem:[#allocation2 + $0xd0] sm:$0xff] }
 0x31a   :  { %871 = vmatpush2.msra.mxu1 %v2734_v6  ;;  %v1384_v6 = vld [vmem:[#allocation2 + $0xb8] sm:$0xff] }
 0x31b   :  { %872 = vmatprep.subr.mxu1 %v2735_v10  ;;  %v1385_v10 = vld [vmem:[#allocation2 + $0xb0] sm:$0xff] }
 0x31c   :  { %873 = vmatpush2.msra.mxu1 %v2736_v14  ;;  %v1386_v14 = vld [vmem:[#allocation2 + $0x98] sm:$0xff] }
 0x31d   :  { %874 = vmatprep.subr.mxu1 %v2737_v17  ;;  %v1387_v17 = vld [vmem:[#allocation2 + $0x90] sm:$0xff] }
 0x31e   :  { %875 = vmatpush2.msra.mxu1 %v2738_v20  ;;  %v1388_v20 = vld [vmem:[#allocation2 + $0x78] sm:$0xff] }
 0x31f   :  { %1264 = vmatprep.subr.mxu1 %v2645_v51 }
 0x39e   :  { %v646_v23 = vpop.f32.mrf.mxu0  ;;  %v717_v44 = vpop.f32.mrf.mxu1 }
 0x39f   :  { %v647_v29 = vadd.f32 %v646_v23, %v2739_v26  ;;  %v718_v22 = vadd.f32 %v717_v44, %v2167_v12  ;;  %v1389_v23 = vld [vmem:[#allocation2 + $0x70] sm:$0xff] }
 0x3a0   :  { %v648_v35 = vpop.f32.mrf.mxu0  ;;  %v719_v47 = vpop.f32.mrf.mxu1  ;;  %v1397_v44 = vld [vmem:[#allocation2 + $0x3f0] sm:$0xff] }
 0x3a1   :  { %v1086_v32 = vmul.f32 -1.442695, %v647_v29  ;;  %v649_v41 = vadd.f32 %v648_v35, %v2740_v38  ;;  %v720_v52 = vadd.f32 %v719_v47, %v2165_v62  ;;  %v1390_v29 = vld [vmem:[#allocation2 + $0x58] sm:$0xff]  ;;  %v1399_v47 = vld [vmem:[#allocation2 + $0x3d0] sm:$0xff] }
 0x3a2   :  { %v1392_v35 = vld [vmem:[#allocation2 + $0x38] sm:$0xff] }
 0x3a3   :  { %1323 = vpow2.f32 %v1086_v32  ;;  %v1087_v43 = vmul.f32 -1.442695, %v649_v41  ;;  %v1391_v32 = vld [vmem:[#allocation2 + $0x50] sm:$0xff] }
 0x3a4   :  { %v1393_v41 = vld [vmem:[#allocation2 + $0x30] sm:$0xff] }
 0x3a5   :  { %1325 = vpow2.f32 %v1087_v43  ;;  %v1394_v43 = vld [vmem:[#allocation2 + $0x18] sm:$0xff] }
 0x3b0   :  { %v1324_v33 = vpop.eup %1323 }
 0x3b1   :  { %v725_v34 = vadd.f32 1.0, %v1324_v33  ;;  %v1395_v33 = vld [vmem:[#allocation2 + $0x10] sm:$0xff] }
 0x3b2   :  { %v1326_v45 = vpop.eup %1325 }
 0x3b3   :  { %1327 = vrcp.f32 %v725_v34  ;;  %v731_v49 = vadd.f32 1.0, %v1326_v45  ;;  %v1396_v34 = vld [vmem:[#allocation2 + $0x3f8] sm:$0xff] }
 0x3b4   :  { %v1398_v45 = vld [vmem:[#allocation2 + $0x3d8] sm:$0xff] }
 0x3b5   :  { %1329 = vrcp.f32 %v731_v49  ;;  %v1400_v49 = vld [vmem:[#allocation2 + $0x3b8] sm:$0xff] }
 0x3c0   :  { %v1328_v54 = vpop.eup %1327 }
 0x3c1   :  { %v734_v57 = vmul.f32 %v1328_v54, %v720_v52  ;;  %v1401_v52 = vld [vmem:[#allocation2 + $0x3b0] sm:$0xff] }
 0x3c2   :  { %v1330_v59 = vpop.eup %1329  ;;  %v2741_v54 = vld [vmem:[#allocation58_spill] sm:$0xff] }
 0x3c3   :  { %v735_v24 = vadd.f32 %v734_v57, %v718_v22  ;;  %v737_v25 = vsub.f32 1.0, %v1330_v59  ;;  %v739_v60 = vmul.f32 %v1330_v59, %v2172_v15  ;;  %v1371_v15 = vld [vmem:[#allocation2 + $0x190] sm:$0xff]  ;;  %v2742_v22 = vld [vmem:[#allocation59_spill] sm:$0xff]  ;;  %v2743_v57 = vld [vmem:[#allocation60_spill] sm:$0xff] }
 0x3c4   :  { %v2745_v59 = vld [vmem:[#allocation64_spill] sm:$0xff] }
 0x3c5   :  { %1331 = vtanh.f32 %v735_v24  ;;  %v2744_v24 = vld [vmem:[#allocation62_spill] sm:$0xff] }
 0x3d2   :  { %v1332_v63 = vpop.eup %1331 }
 0x3d3   :  { %v738_v27 = vmul.f32 %v1332_v63, %v737_v25  ;;  %v2752_v25 = vld [vmem:[#allocation78_spill] sm:$0xff]  ;;  %v2753_v63 = vld [vmem:[#allocation88_spill] sm:$0xff] }
 0x3d5   :  { %v2322_v28 = vadd.f32 %v739_v60, %v738_v27  ;;  %v2754_v27 = vld [vmem:[#allocation92_spill] sm:$0xff] }
 0x3d7   :  { %1262 = vmatmul.mubr.f32.vlgmr.msra.gmra.mxu0 %v2322_v28  ;;  %876 = vmatprep.mubr.f32.mxu1 %v2322_v28 }
 0x3d8   :  { %947 = vmatprep.mubr.f32.mxu0 %v2322_v28  ;;  %884 = vmatpush1.msra.mxu0 %v1365_v9 }
 0x3d9   :  { %885 = vmatprep.subr.mxu0 %v1366_v30 }
 0x3da   :  { %886 = vmatpush1.msra.mxu0 %v1367_v21  ;;  %v233_v21 = vld [vmem:[%s2439_s7 + $0x48] sm:$0xff] }
 0x3db   :  { %887 = vmatprep.subr.mxu0 %v1368_v31  ;;  %v232_v31 = vld [vmem:[%s2439_s7 + $0x40] sm:$0xff] }
 0x3dc   :  { %888 = vmatpush1.msra.mxu0 %v1369_v61  ;;  %v231_v61 = vld [vmem:[%s2439_s7 + $0x38] sm:$0xff] }
 0x3dd   :  { %889 = vmatprep.subr.mxu0 %v1370_v36  ;;  %v230_v36 = vld [vmem:[%s2439_s7 + $0x30] sm:$0xff] }
 0x3de   :  { %890 = vmatpush1.msra.mxu0 %v1371_v15  ;;  %v229_v15 = vld [vmem:[%s2439_s7 + $0x28] sm:$0xff] }
 0x3df   :  { %891 = vmatprep.subr.mxu0 %v1372_v0  ;;  %v228_v0 = vld [vmem:[%s2439_s7 + $0x20] sm:$0xff] }
 0x3e0   :  { %892 = vmatpush1.msra.mxu0 %v1373_v37  ;;  %v227_v37 = vld [vmem:[%s2439_s7 + $0x18] sm:$0xff] }
 0x3e1   :  { %893 = vmatprep.subr.mxu0 %v1374_v39  ;;  %v226_v39 = vld [vmem:[%s2439_s7 + $0x10] sm:$0xff] }
 0x3e2   :  { %894 = vmatpush1.msra.mxu0 %v1375_v40  ;;  %v225_v40 = vld [vmem:[%s2439_s7 + $0x8] sm:$0xff] }
 0x3e3   :  { %895 = vmatprep.subr.mxu0 %v1376_v42  ;;  %v224_v42 = vld [vmem:[%s2439_s7] sm:$0xff] }
 0x3e4   :  { %896 = vmatpush1.msra.mxu0 %v1377_v46 }
 0x3e5   :  { %897 = vmatprep.subr.mxu0 %v1378_v48 }
 0x3e6   :  { %898 = vmatpush1.msra.mxu0 %v1379_v50 }
 0x3e7   :  { %899 = vmatprep.subr.mxu0 %v1380_v3 }
 0x3e8   :  { %900 = vmatpush1.msra.mxu0 %v1381_v2 }
 0x3e9   :  { %901 = vmatprep.subr.mxu0 %v1382_v1 }
 0x3ea   :  { %902 = vmatpush1.msra.mxu0 %v1383_v4 }
 0x3eb   :  { %903 = vmatprep.subr.mxu0 %v1384_v6 }
 0x3ec   :  { %904 = vmatpush1.msra.mxu0 %v1385_v10 }
 0x3ed   :  { %905 = vmatprep.subr.mxu0 %v1386_v14 }
 0x3ee   :  { %906 = vmatpush1.msra.mxu0 %v1387_v17 }
 0x3ef   :  { %907 = vmatprep.subr.mxu0 %v1388_v20 }
 0x3f0   :  { %908 = vmatpush1.msra.mxu0 %v1389_v23 }
 0x3f1   :  { %909 = vmatprep.subr.mxu0 %v1390_v29 }
 0x3f2   :  { %910 = vmatpush1.msra.mxu0 %v1391_v32 }
 0x3f3   :  { %911 = vmatprep.subr.mxu0 %v1392_v35 }
 0x3f4   :  { %912 = vmatpush1.msra.mxu0 %v1393_v41 }
 0x3f5   :  { %913 = vmatprep.subr.mxu0 %v1394_v43 }
 0x3f6   :  { %914 = vmatpush1.msra.mxu0 %v1395_v33 }
 0x3f7   :  { %915 = vmatprep.subr.mxu0 %v1396_v34 }
 0x3f8   :  { %916 = vmatpush2.msra.mxu0 %v1397_v44 }
 0x3f9   :  { %917 = vmatprep.subr.mxu0 %v1398_v45 }
 0x3fa   :  { %918 = vmatpush2.msra.mxu0 %v1399_v47 }
 0x3fb   :  { %919 = vmatprep.subr.mxu0 %v1400_v49 }
 0x3fc   :  { %920 = vmatpush2.msra.mxu0 %v1401_v52 }
 0x3fd   :  { %921 = vmatprep.subr.mxu0 %v2697_v16  ;;  %v2746_v16 = vld [vmem:[#allocation66_spill] sm:$0xff] }
 0x3fe   :  { %922 = vmatpush2.msra.mxu0 %v2698_v18  ;;  %v2747_v18 = vld [vmem:[#allocation68_spill] sm:$0xff] }
 0x3ff   :  { %923 = vmatprep.subr.mxu0 %v2699_v8  ;;  %v2748_v8 = vld [vmem:[#allocation70_spill] sm:$0xff] }
 0x400   :  { %924 = vmatpush2.msra.mxu0 %v2700_v53  ;;  %v2749_v53 = vld [vmem:[#allocation72_spill] sm:$0xff] }
 0x401   :  { %925 = vmatprep.subr.mxu0 %v2701_v11  ;;  %v2750_v11 = vld [vmem:[#allocation74_spill] sm:$0xff] }
 0x402   :  { %926 = vmatpush2.msra.mxu0 %v2702_v13  ;;  %v2751_v13 = vld [vmem:[#allocation76_spill] sm:$0xff] }
 0x403   :  { %927 = vmatprep.subr.mxu0 %v2741_v54 }
 0x404   :  { %928 = vmatpush2.msra.mxu0 %v2742_v22 }
 0x405   :  { %929 = vmatprep.subr.mxu0 %v2743_v57 }
 0x406   :  { %930 = vmatpush2.msra.mxu0 %v2744_v24 }
 0x407   :  { %931 = vmatprep.subr.mxu0 %v2745_v59 }
 0x408   :  { %932 = vmatpush2.msra.mxu0 %v2746_v16 }
 0x409   :  { %933 = vmatprep.subr.mxu0 %v2747_v18 }
 0x40a   :  { %934 = vmatpush2.msra.mxu0 %v2748_v8 }
 0x40b   :  { %935 = vmatprep.subr.mxu0 %v2749_v53 }
 0x40c   :  { %936 = vmatpush2.msra.mxu0 %v2750_v11 }
 0x40d   :  { %937 = vmatprep.subr.mxu0 %v2751_v13 }
 0x40e   :  { %938 = vmatpush2.msra.mxu0 %v2752_v25 }
 0x40f   :  { %939 = vmatprep.subr.mxu0 %v2715_v7  ;;  %v239_v7 = vld [vmem:[%s2439_s7 + $0x78] sm:$0xff] }
 0x410   :  { %940 = vmatpush2.msra.mxu0 %v2716_v5  ;;  %v238_v5 = vld [vmem:[%s2439_s7 + $0x70] sm:$0xff] }
 0x411   :  { %941 = vmatprep.subr.mxu0 %v2717_v55  ;;  %v236_v55 = vld [vmem:[%s2439_s7 + $0x60] sm:$0xff] }
 0x412   :  { %942 = vmatpush2.msra.mxu0 %v2718_v58  ;;  %v235_v58 = vld [vmem:[%s2439_s7 + $0x58] sm:$0xff] }
 0x413   :  { %943 = vmatprep.subr.mxu0 %v2753_v63 }
 0x414   :  { %944 = vmatpush2.msra.mxu0 %v2720_v19  ;;  %v234_v19 = vld [vmem:[%s2439_s7 + $0x50] sm:$0xff] }
 0x415   :  { %945 = vmatprep.subr.mxu0 %v2754_v27 }
 0x416   :  { %946 = vmatpush2.msra.mxu0 %v2013_v56  ;;  %v237_v56 = vld [vmem:[%s2439_s7 + $0x68] sm:$0xff]  ;;  %s1498_s7 = smov [#allocation8]  }
 0x417   :  { %s1068_s23 = sshll.u32 %s1498_s7, 4  ;;  %s1069_s23 = int_to_ptr.vmem [resolvable:$true] %s1068_s23 }
 0x418   :  { %s1442_s24 = scalar_lea.vmem %s1069_s23, 128  ;;  %p1447_p11 = scmp.lt.s32.totalorder %s1069_s23, %s1069_s23 }
 0x419   :  { %p1443_p10 = scmp.ne.s32.totalorder %s1069_s23, %s1442_s24  ;;  %p1448_p12 = scmp.lt.s32.totalorder %s1442_s24, %s1442_s24 }
 0x41b   :  { %p1449_p13 = por %p1448_p12, %p1447_p11 }
 0x41d   :  { %p1450_p0 = pnand %p1449_p13, %p1443_p10 }
 0x497   :  { %v807_v60 = vpop.f32.mrf.mxu0 }
 0x498   :  { %v811_v9 = vmul.f32 0.25, %v807_v60 }
 0x499   :  { %v1263_v30 = vpop.f32.mrf.mxu0 }
 0x49a   :  { %877 = vmatmul.mubr.f32.vlgmr.msra.gmra.mxu1 %v811_v9  ;;  %948 = vmatmul.mubr.f32.vlgmr.msra.gmra.mxu0 %v811_v9 }
 0x49b   :  { %1296 = vmatprep.mubr.msk.f32.mxu1 %vm1497_vm0, %v2645_v51  ;;  %1265 = vmatpush3.msra.mxu1 %v239_v7 }
 0x49c   :  { %1266 = vmatprep.subr.mxu1 %v2645_v51 }
 0x49d   :  { %1267 = vmatpush3.msra.mxu1 %v238_v5 }
 0x49e   :  { %1268 = vmatprep.subr.mxu1 %v2645_v51 }
 0x49f   :  { %1269 = vmatpush3.msra.mxu1 %v237_v56 }
 0x4a0   :  { %1270 = vmatprep.subr.mxu1 %v2645_v51 }
 0x4a1   :  { %1271 = vmatpush3.msra.mxu1 %v236_v55 }
 0x4a2   :  { %1272 = vmatprep.subr.mxu1 %v2645_v51 }
 0x4a3   :  { %1273 = vmatpush3.msra.mxu1 %v235_v58 }
 0x4a4   :  { %1274 = vmatprep.subr.mxu1 %v2645_v51 }
 0x4a5   :  { %1275 = vmatpush3.msra.mxu1 %v234_v19 }
 0x4a6   :  { %1276 = vmatprep.subr.mxu1 %v2645_v51 }
 0x4a7   :  { %1277 = vmatpush3.msra.mxu1 %v233_v21 }
 0x4a8   :  { %1278 = vmatprep.subr.mxu1 %v2645_v51 }
 0x4a9   :  { %1279 = vmatpush3.msra.mxu1 %v232_v31 }
 0x4aa   :  { %1280 = vmatprep.subr.mxu1 %v2645_v51 }
 0x4ab   :  { %1281 = vmatpush3.msra.mxu1 %v231_v61 }
 0x4ac   :  { %1282 = vmatprep.subr.mxu1 %v2645_v51 }
 0x4ad   :  { %1283 = vmatpush3.msra.mxu1 %v230_v36 }
 0x4ae   :  { %1284 = vmatprep.subr.mxu1 %v2645_v51 }
 0x4af   :  { %1285 = vmatpush3.msra.mxu1 %v229_v15 }
 0x4b0   :  { %1286 = vmatprep.subr.mxu1 %v2645_v51 }
 0x4b1   :  { %1287 = vmatpush3.msra.mxu1 %v228_v0 }
 0x4b2   :  { %1288 = vmatprep.subr.mxu1 %v2645_v51 }
 0x4b3   :  { %1289 = vmatpush3.msra.mxu1 %v227_v37 }
 0x4b4   :  { %1290 = vmatprep.subr.mxu1 %v2645_v51 }
 0x4b5   :  { %1291 = vmatpush3.msra.mxu1 %v226_v39 }
 0x4b6   :  { %1292 = vmatprep.subr.mxu1 %v2645_v51 }
 0x4b7   :  { %1293 = vmatpush3.msra.mxu1 %v225_v40 }
 0x4b8   :  { %1294 = vmatprep.subr.mxu1 %v2645_v51 }
 0x4b9   :  { %1295 = vmatpush3.msra.mxu1 %v224_v42 }
 0x55a   :  { %v878_v46 = vpop.f32.mrf.mxu1  ;;  %v949_v10 = vpop.f32.mrf.mxu0 }
 0x55b   :  { %v879_v48 = vadd.f32 %v878_v46, %v2739_v26  ;;  %v950_v29 = vadd.f32 %v949_v10, %v2167_v12 }
 0x55c   :  { %v880_v3 = vpop.f32.mrf.mxu1  ;;  %v951_v17 = vpop.f32.mrf.mxu0 }
 0x55d   :  { %v1088_v50 = vmul.f32 -1.442695, %v879_v48  ;;  %v881_v2 = vadd.f32 %v880_v3, %v2740_v38  ;;  %v952_v51 = vadd.f32 %v951_v17, %v2165_v62 }
 0x55f   :  { %1333 = vpow2.f32 %v1088_v50  ;;  %v1089_v1 = vmul.f32 -1.442695, %v881_v2 }
 0x561   :  { %1335 = vpow2.f32 %v1089_v1 }
 0x56c   :  { %v1334_v4 = vpop.eup %1333 }
 0x56d   :  { %v957_v6 = vadd.f32 1.0, %v1334_v4 }
 0x56e   :  { %v1336_v14 = vpop.eup %1335 }
 0x56f   :  { %1337 = vrcp.f32 %v957_v6  ;;  %v963_v20 = vadd.f32 1.0, %v1336_v14 }
 0x571   :  { %1339 = vrcp.f32 %v963_v20 }
 0x57c   :  { %v1338_v23 = vpop.eup %1337 }
 0x57d   :  { %v966_v26 = vmul.f32 %v1338_v23, %v952_v51 }
 0x57e   :  { %v1340_v35 = vpop.eup %1339 }
 0x57f   :  { %v967_v32 = vadd.f32 %v966_v26, %v950_v29  ;;  %v969_v38 = vsub.f32 1.0, %v1340_v35  ;;  %v971_v33 = vmul.f32 %v1340_v35, %v2322_v28 }
 0x581   :  { %1341 = vtanh.f32 %v967_v32 }
 0x58e   :  { %v1342_v41 = vpop.eup %1341 }
 0x58f   :  { %v970_v43 = vmul.f32 %v1342_v41, %v969_v38 }
 0x591   :  { %v972_v34 = vadd.f32 %v971_v33, %v970_v43 }
 0x593   :  { %1297 = vmatmul.mubr.f32.vlgmr.msra.gmra.mxu1 %v972_v34  ;;  %1051 = vst [vmem:[#allocation8] sm:$0xff] %v972_v34 }
 0x594   :  { %1453 = shalt.err (!%p1450_p0)
}
 0x595   :  { %1071 = dma.vmem_to_hbm [thread:$0]  %s1069_s23, 128, %s2442_s10, [#allocation9]   ;;  %v1090_v62 = vld [vmem:[%s2440_s8] ss:$0 sm:$0xff]  ;;  %vm1049_vm1 = vcmask 261120  }
 0x596   :  { %s1499_s28 = smov [#allocation7]  }
 0x597   :  { %s1058_s29 = sshll.u32 %s1499_s28, 4  ;;  %s1059_s29 = int_to_ptr.vmem [resolvable:$true] %s1058_s29 }
 0x598   :  { %s1462_s6 = scalar_lea.vmem %s1059_s29, 128  ;;  %p1467_p2 = scmp.lt.s32.totalorder %s1059_s29, %s1059_s29 }
 0x599   :  { %p1463_p1 = scmp.ne.s32.totalorder %s1059_s29, %s1462_s6  ;;  %p1468_p3 = scmp.lt.s32.totalorder %s1462_s6, %s1462_s6 }
 0x59b   :  { %p1469_p4 = por %p1468_p3, %p1467_p2 }
 0x59d   :  { %p1470_p5 = pnand %p1469_p4, %p1463_p1 }
 0x653   :  { %v1045_v12 = vpop.f32.mrf.mxu1 }
 0x654   :  { %v1046_v28 = vadd.f32 %v1090_v62, %v1045_v12 }
 0x655   :  { %v1298_v44 = vpop.f32.mrf.mxu1 }
 0x656   :  { %1050 = vst.msk [vmem:[#allocation7] sm:$0xff] %vm1049_vm1, %v1046_v28 }
 0x657   :  { %1473 = shalt.err (!%p1470_p5)
}
 0x658   :  { %1061 = dma.vmem_to_hbm [thread:$0]  %s1059_s29, 128, %s2441_s9, [#allocation4]  }
 0x659   :  { %1486 = dma.done.wait [#allocation4], 128  }
 0x65a   :  { %1487 = vsyncadd [#allocation4], 4294967168 }
 0x65b   :  { %1488 = dma.done.wait [#allocation9], 128  }
 0x65c   :  { %1489 = vsyncadd [#allocation9], 4294967168 }
 0x65d   :  { %1078 = vsyncpa [#allocation3], 1 }
 0x65e   :  { %1079 = vsyncpa [#allocation6], 1 }
 0x65f   :  { %1080 = vsyncpa [#allocation4], 1 }
 0x660   :  { %1081 = vsyncpa [#allocation9], 1 }

</bundles_post_ra>
